<compile_context>
chip_gen: v7x
topology: tpu7x:2x2x1
jax: 0.10.0
libtpu: 0.0.40
codegen_flags: <defaults>
</compile_context>

<pallas_src>
import functools
import inspect

import jax
import jax.numpy as jnp
from jax.experimental import pallas as pl
from jax.experimental.pallas import tpu as pltpu

LN_EPS = 1e-5


def _blockspec_supports_pipeline_mode():
    if not hasattr(pl, "Buffered"):
        return False
    try:
        return "pipeline_mode" in inspect.signature(pl.BlockSpec).parameters
    except (TypeError, ValueError):
        return False


_HAS_PIPELINE_MODE = _blockspec_supports_pipeline_mode()


def _vmem_budget_bytes():
    # Hardware probe only (not guarding kernel compilation): leave ~25% headroom for
    # compiler scratch.  Falls back to a 128 MiB-class part if the query is unavailable.
    try:
        cap = int(pltpu.get_tpu_info().vmem_capacity_bytes)
    except Exception:
        cap = 128 << 20
    return (cap * 3) // 4


def _choose_query_tile(L):
    if L <= 256:
        return L
    for t in (256, 128, 64, 32, 16, 8):
        if L % t == 0:
            return t
    return L


def _layer_norm(x, gamma, beta):
    # LayerNorm over last dim, biased variance (matches nn.LayerNorm, eps=1e-5).
    mu = jnp.mean(x, axis=-1, keepdims=True)
    var = jnp.mean((x - mu) ** 2, axis=-1, keepdims=True)
    return (x - mu) * jax.lax.rsqrt(var + LN_EPS) * gamma + beta


def encoder_layer_kernel(
    # inputs
    x_ref,
    wqkv_ref, bqkv_ref,
    wo_ref, bo_ref,
    g1_ref, be1_ref,
    w1_ref, b1_ref, w2_ref, b2_ref,
    g2_ref, be2_ref,
    # outputs
    out_ref, attn_ref,
    # scratch
    q_sc, k_sc, v_sc,
    *, n_head, d_k, d_v, tq,
):
    cd = wqkv_ref.dtype            # matmul compute dtype (weights arrive pre-cast)
    qi = pl.program_id(1)
    L = x_ref.shape[1]
    Hk = n_head * d_k
    Hv = n_head * d_v
    scale = 1.0 / (float(d_k) ** 0.5)

    # --- fused Q/K/V projection, once per sequence (query tiles reuse the scratch) ---
    @pl.when(qi == 0)
    def _project_qkv():
        x_full = x_ref[0]                                                  # (L, D) f32
        qkv = jnp.dot(x_full.astype(cd), wqkv_ref[...],
                      preferred_element_type=jnp.float32) + bqkv_ref[...]  # (L, 2Hk+Hv)
        q = qkv[:, :Hk].reshape(L, n_head, d_k)
        k = qkv[:, Hk:2 * Hk].reshape(L, n_head, d_k)
        v = qkv[:, 2 * Hk:].reshape(L, n_head, d_v)
        # one head-major relayout per tensor (no per-head stack/concat)
        q_sc[...] = jnp.transpose(q, (1, 0, 2)).astype(cd)                 # (H, L, d_k)
        k_sc[...] = jnp.transpose(k, (1, 0, 2)).astype(cd)                 # (H, L, d_k)
        v_sc[...] = jnp.transpose(v, (1, 0, 2)).astype(cd)                 # (H, L, d_v)

    q0 = pl.multiple_of(qi * tq, tq)
    x_tile = x_ref[0, pl.ds(q0, tq), :]                                    # (tq, D) f32
    q_tile = q_sc[:, pl.ds(q0, tq), :]                                     # (H, tq, d_k)

    # --- scaled dot-product attention (full key axis resident, no mask) ---
    s = jnp.einsum('hqd,hkd->hqk', q_tile, k_sc[...],
                   preferred_element_type=jnp.float32) * scale             # (H, tq, L) f32
    s = s - jnp.max(s, axis=-1, keepdims=True)
    e = jnp.exp(s)
    p = e * pl.reciprocal(jnp.sum(e, axis=-1, keepdims=True), approx=False)

    # head-major attention probabilities, written in attn_ref's (bf16) dtype
    attn_ref[...] = jnp.expand_dims(p, 1).astype(attn_ref.dtype)           # (H, 1, tq, L)

    ctx = jnp.einsum('hqk,hkd->hqd', p.astype(cd), v_sc[...],
                     preferred_element_type=jnp.float32)                   # (H, tq, d_v)
    ctx = jnp.transpose(ctx, (1, 0, 2)).reshape(tq, Hv)                    # (tq, Hv)
    proj = jnp.dot(ctx.astype(cd), wo_ref[...],
                   preferred_element_type=jnp.float32) + bo_ref[...]

    # residual + LN (attention sub-layer); dropout is identity in eval mode
    a1 = _layer_norm(proj + x_tile, g1_ref[...], be1_ref[...])

    # --- position-wise FFN (Conv1d k=1 == per-token Linear) ---
    h1 = jnp.maximum(
        jnp.dot(a1.astype(cd), w1_ref[...], preferred_element_type=jnp.float32)
        + b1_ref[...], 0.0)
    h2 = jnp.dot(h1.astype(cd), w2_ref[...], preferred_element_type=jnp.float32) + b2_ref[...]

    out = _layer_norm(h2 + a1, g2_ref[...], be2_ref[...])
    out_ref[0] = out.astype(out_ref.dtype)


def prepare_weights(params, matmul_dtype=jnp.bfloat16):
    """Fuse + pre-cast weights ONCE (outside the per-call path)."""
    wqkv = jnp.concatenate([params["wq"], params["wk"], params["wv"]], axis=1)
    bqkv = jnp.concatenate([params["bq"], params["bk"], params["bv"]], axis=1)
    f32 = jnp.float32
    return (
        wqkv.astype(matmul_dtype), bqkv.astype(f32),
        params["wo"].astype(matmul_dtype), params["bo"].astype(f32),
        params["ln1_g"].astype(f32), params["ln1_b"].astype(f32),
        params["w1"].astype(matmul_dtype), params["b1"].astype(f32),
        params["w2"].astype(matmul_dtype), params["b2"].astype(f32),
        params["ln2_g"].astype(f32), params["ln2_b"].astype(f32),
    )


def encoder_layer_prepared(x, weights, *, n_head, d_k, d_v, attn_dtype=jnp.bfloat16):
    """x: (B, L, D) float32; weights: output of prepare_weights().
    Returns (enc_output (B, L, D) f32, attn (n_head*B, L, L) attn_dtype)."""
    B, L, D = x.shape
    Hk, Hv = n_head * d_k, n_head * d_v
    wqkv = weights[0]
    assert wqkv.shape == (D, 2 * Hk + Hv)
    d_inner = weights[6].shape[1]          # w1: (D, d_inner)
    mm_dtype = wqkv.dtype
    mm_isz = jnp.dtype(mm_dtype).itemsize
    attn_isz = jnp.dtype(attn_dtype).itemsize

    tq = _choose_query_tile(L)
    nq = L // tq

    weight_bytes = sum(int(w.size) * jnp.dtype(w.dtype).itemsize for w in weights)
    # Single-buffer grid-invariant weights only when it matters and the API supports it.
    single_buffer = _HAS_PIPELINE_MODE and weight_bytes >= (4 << 20)

    def wspec(arr):
        ndim = arr.ndim
        idx = lambda b, qi, _nd=ndim: (0,) * _nd
        if single_buffer:
            return pl.BlockSpec(arr.shape, idx, pipeline_mode=pl.Buffered(1))
        return pl.BlockSpec(arr.shape, idx)

    in_specs = [pl.BlockSpec((1, L, D), lambda b, qi: (b, 0, 0))] + [wspec(w) for w in weights]
    out_specs = [
        pl.BlockSpec((1, tq, D), lambda b, qi: (b, qi, 0)),
        # head-major attention block -> wrapper reshape to (n_head*B, L, L) is free
        pl.BlockSpec((n_head, 1, tq, L), lambda b, qi: (0, b, qi, 0)),
    ]
    out_shapes = [
        jax.ShapeDtypeStruct((B, L, D), jnp.float32),
        jax.ShapeDtypeStruct((n_head, B, L, L), attn_dtype),
    ]
    scratch_shapes = [
        pltpu.VMEM((n_head, L, d_k), mm_dtype),   # q
        pltpu.VMEM((n_head, L, d_k), mm_dtype),   # k
        pltpu.VMEM((n_head, L, d_v), mm_dtype),   # v
    ]

    # VMEM budget: resident weights + pipelined blocks + scratch + in-kernel temporaries,
    # capped at ~75% of the device's physical VMEM (v7x: ~48 MiB, v6e/v5e: ~96 MiB).
    resident_w = weight_bytes if single_buffer else 2 * weight_bytes
    blocks = 2 * (L * D * 4 + tq * D * 4 + n_head * tq * L * attn_isz)
    scratch_b = n_head * L * (2 * d_k + d_v) * mm_isz
    temps = 4 * (L * (2 * Hk + Hv) + 2 * n_head * tq * L + tq * (Hv + d_inner + 4 * D))
    needed = int(1.3 * (resident_w + blocks + scratch_b + temps))
    vmem_limit = int(min(max(needed, 32 << 20), _vmem_budget_bytes()))

    flops = 2 * B * (L * D * (2 * Hk + Hv)            # fused QKV projection
                     + n_head * L * L * (d_k + d_v)   # scores + context
                     + L * Hv * D                     # output projection
                     + 2 * L * D * d_inner)           # FFN
    cost = pl.CostEstimate(
        flops=flops,
        transcendentals=B * n_head * L * L + 4 * B * L,
        bytes_accessed=int(2 * B * L * D * 4 + weight_bytes + n_head * B * L * L * attn_isz),
    )

    kernel = functools.partial(encoder_layer_kernel,
                               n_head=n_head, d_k=d_k, d_v=d_v, tq=tq)

    enc_out, attn = pl.pallas_call(
        kernel,
        out_shape=out_shapes,
        grid_spec=pltpu.PrefetchScalarGridSpec(
            num_scalar_prefetch=0,
            grid=(B, nq),
            in_specs=in_specs,
            out_specs=out_specs,
            scratch_shapes=scratch_shapes,
        ),
        compiler_params=pltpu.CompilerParams(
            dimension_semantics=("parallel", "arbitrary"),
            vmem_limit_bytes=vmem_limit,
        ),
        cost_estimate=cost,
    )(x, *weights)

    # (n_head, B, L, L) -> (n_head*B, L, L): contiguous (free) reshape, PyTorch head-major.
    return enc_out, attn.reshape(n_head * B, L, L)


def encoder_layer(x, params, *, n_head, d_k, d_v,
                  matmul_dtype=jnp.bfloat16, attn_dtype=jnp.bfloat16):
    """Convenience wrapper: prefer prepare_weights() once + encoder_layer_prepared()."""
    weights = prepare_weights(params, matmul_dtype)
    return encoder_layer_prepared(x, weights, n_head=n_head, d_k=d_k, d_v=d_v,
                                  attn_dtype=attn_dtype)


def init_params(key, d_model, d_inner, n_head, d_k, d_v):
    ks = jax.random.split(key, 8)
    scale = 0.02
    return {
        "wq": scale * jax.random.normal(ks[0], (d_model, n_head * d_k), jnp.float32),
        "bq": jnp.zeros((1, n_head * d_k), jnp.float32),
        "wk": scale * jax.random.normal(ks[1], (d_model, n_head * d_k), jnp.float32),
        "bk": jnp.zeros((1, n_head * d_k), jnp.float32),
        "wv": scale * jax.random.normal(ks[2], (d_model, n_head * d_v), jnp.float32),
        "bv": jnp.zeros((1, n_head * d_v), jnp.float32),
        "wo": scale * jax.random.normal(ks[3], (n_head * d_v, d_model), jnp.float32),
        "bo": scale * jax.random.normal(ks[4], (1, d_model), jnp.float32),
        "ln1_g": jnp.ones((1, d_model), jnp.float32),
        "ln1_b": jnp.zeros((1, d_model), jnp.float32),
        # Conv1d(d_in, d_hid, 1) weight (d_hid, d_in, 1) stored transposed as (d_in, d_hid)
        "w1": scale * jax.random.normal(ks[5], (d_model, d_inner), jnp.float32),
        "b1": scale * jax.random.normal(ks[6], (1, d_inner), jnp.float32),
        "w2": scale * jax.random.normal(ks[7], (d_inner, d_model), jnp.float32),
        "b2": jnp.zeros((1, d_model), jnp.float32),
        "ln2_g": jnp.ones((1, d_model), jnp.float32),
        "ln2_b": jnp.zeros((1, d_model), jnp.float32),
    }


def _reference(x, params, n_head, d_k, d_v):
    # Pure-JAX f32 reference mirroring the PyTorch EncoderLayer (eval mode, no mask).
    B, L, D = x.shape

    def ln(y, g, b):
        mu = jnp.mean(y, axis=-1, keepdims=True)
        var = jnp.mean((y - mu) ** 2, axis=-1, keepdims=True)
        return (y - mu) * jax.lax.rsqrt(var + LN_EPS) * g + b

    q = x @ params["wq"] + params["bq"]
    k = x @ params["wk"] + params["bk"]
    v = x @ params["wv"] + params["bv"]

    def split(t, d):
        return t.reshape(B, L, n_head, d).transpose(2, 0, 1, 3).reshape(n_head * B, L, d)

    qh, kh, vh = split(q, d_k), split(k, d_k), split(v, d_v)
    attn = jnp.einsum('nqd,nkd->nqk', qh, kh) / (float(d_k) ** 0.5)
    attn = jax.nn.softmax(attn, axis=-1)
    o = jnp.einsum('nqk,nkd->nqd', attn, vh)
    o = o.reshape(n_head, B, L, d_v).transpose(1, 2, 0, 3).reshape(B, L, n_head * d_v)
    o = o @ params["wo"] + params["bo"]
    a1 = ln(o + x, params["ln1_g"], params["ln1_b"])
    h = jnp.maximum(a1 @ params["w1"] + params["b1"], 0.0)
    h = h @ params["w2"] + params["b2"]
    return ln(h + a1, params["ln2_g"], params["ln2_b"]), attn


if __name__ == "__main__":
    # small shapes: batch=2, seq=8, d_model=32, d_inner=64, n_head=4, d_k=d_v=8
    B, L = 2, 8
    d_model, d_inner, n_head, d_k, d_v = 32, 64, 4, 8, 8

    key = jax.random.PRNGKey(0)
    k_x, k_p = jax.random.split(key)
    x = jax.random.normal(k_x, (B, L, d_model), jnp.float32)
    params = init_params(k_p, d_model, d_inner, n_head, d_k, d_v)

    # Hoisted weight fusion / bf16 pre-cast (do once, reuse across calls).
    weights = prepare_weights(params, matmul_dtype=jnp.bfloat16)

    enc_out, attn = encoder_layer_prepared(x, weights, n_head=n_head, d_k=d_k, d_v=d_v)
    jax.block_until_ready((enc_out, attn))

    assert enc_out.shape == (B, L, d_model)
    assert attn.shape == (n_head * B, L, L)

    ref_out, ref_attn = _reference(x, params, n_head, d_k, d_v)
    assert float(jnp.max(jnp.abs(enc_out - ref_out))) < 2e-2
    assert float(jnp.max(jnp.abs(attn.astype(jnp.float32) - ref_attn))) < 2e-2
    print("KERNEL_OK")
</pallas_src>

<mosaic_0001>
module attributes {stable_mosaic.version = 11 : i64} {
  func.func @encoder_layer_kernel(%arg0: i32, %arg1: i32, %arg2: memref<1x8x32xf32, #tpu.memory_space<vmem>>, %arg3: memref<32x96xbf16, #tpu.memory_space<vmem>>, %arg4: memref<1x96xf32, #tpu.memory_space<vmem>>, %arg5: memref<32x32xbf16, #tpu.memory_space<vmem>>, %arg6: memref<1x32xf32, #tpu.memory_space<vmem>>, %arg7: memref<1x32xf32, #tpu.memory_space<vmem>>, %arg8: memref<1x32xf32, #tpu.memory_space<vmem>>, %arg9: memref<32x64xbf16, #tpu.memory_space<vmem>>, %arg10: memref<1x64xf32, #tpu.memory_space<vmem>>, %arg11: memref<64x32xbf16, #tpu.memory_space<vmem>>, %arg12: memref<1x32xf32, #tpu.memory_space<vmem>>, %arg13: memref<1x32xf32, #tpu.memory_space<vmem>>, %arg14: memref<1x32xf32, #tpu.memory_space<vmem>>, %arg15: memref<1x8x32xf32, #tpu.memory_space<vmem>>, %arg16: memref<4x1x8x8xbf16, #tpu.memory_space<vmem>>, %arg17: memref<4x8x8xbf16, #tpu.memory_space<vmem>>, %arg18: memref<4x8x8xbf16, #tpu.memory_space<vmem>>, %arg19: memref<4x8x8xbf16, #tpu.memory_space<vmem>>) attributes {dimension_semantics = [#tpu.dimension_semantics<parallel>, #tpu.dimension_semantics<arbitrary>], iteration_bounds = array<i64: 2, 1>, scalar_prefetch = 0 : i64, scratch_operands = 3 : i64, tpu.core_type = #tpu.core_type<tc>, window_params = [{transform_indices = @transform_0, window_bounds = array<i64: 1, 8, 32>}, {pipeline_mode = #tpu.pipeline_mode<synchronous>, transform_indices = @transform_1, window_bounds = array<i64: 32, 96>}, {pipeline_mode = #tpu.pipeline_mode<synchronous>, transform_indices = @transform_2, window_bounds = array<i64: 1, 96>}, {pipeline_mode = #tpu.pipeline_mode<synchronous>, transform_indices = @transform_3, window_bounds = array<i64: 32, 32>}, {pipeline_mode = #tpu.pipeline_mode<synchronous>, transform_indices = @transform_4, window_bounds = array<i64: 1, 32>}, {pipeline_mode = #tpu.pipeline_mode<synchronous>, transform_indices = @transform_5, window_bounds = array<i64: 1, 32>}, {pipeline_mode = #tpu.pipeline_mode<synchronous>, transform_indices = @transform_6, window_bounds = array<i64: 1, 32>}, {pipeline_mode = #tpu.pipeline_mode<synchronous>, transform_indices = @transform_7, window_bounds = array<i64: 32, 64>}, {pipeline_mode = #tpu.pipeline_mode<synchronous>, transform_indices = @transform_8, window_bounds = array<i64: 1, 64>}, {pipeline_mode = #tpu.pipeline_mode<synchronous>, transform_indices = @transform_9, window_bounds = array<i64: 64, 32>}, {pipeline_mode = #tpu.pipeline_mode<synchronous>, transform_indices = @transform_10, window_bounds = array<i64: 1, 32>}, {pipeline_mode = #tpu.pipeline_mode<synchronous>, transform_indices = @transform_11, window_bounds = array<i64: 1, 32>}, {pipeline_mode = #tpu.pipeline_mode<synchronous>, transform_indices = @transform_12, window_bounds = array<i64: 1, 32>}, {transform_indices = @transform_13, window_bounds = array<i64: 1, 8, 32>}, {transform_indices = @transform_14, window_bounds = array<i64: 4, 1, 8, 8>}]} {
    %c0_i32 = arith.constant 0 : i32
    %0 = arith.cmpi eq, %arg1, %c0_i32 : i32
    %1 = arith.extui %0 : i1 to i32
    %c0_i32_0 = arith.constant 0 : i32
    %2 = arith.cmpi ne, %1, %c0_i32_0 : i32
    scf.if %2 {
      %c0_55 = arith.constant 0 : index
      %c0_56 = arith.constant 0 : index
      %c0_57 = arith.constant 0 : index
      %105 = vector.load %arg2[%c0_55, %c0_56, %c0_57] : memref<1x8x32xf32, #tpu.memory_space<vmem>>, vector<1x8x32xf32>
      %106 = vector.shape_cast %105 : vector<1x8x32xf32> to vector<8x32xf32>
      %107 = arith.truncf %106 : vector<8x32xf32> to vector<8x32xbf16>
      %c0_58 = arith.constant 0 : index
      %c0_59 = arith.constant 0 : index
      %108 = vector.load %arg3[%c0_58, %c0_59] : memref<32x96xbf16, #tpu.memory_space<vmem>>, vector<32x96xbf16>
      %cst_60 = arith.constant dense<0.000000e+00> : vector<8x96xf32>
      %109 = tpu.matmul %107, %108, %cst_60 {dimension_numbers = #tpu.dot_dimension_numbers<[1], [0], [0], [1], [0, 0, 1, 1], [], []>} : vector<8x32xbf16>, vector<32x96xbf16>, vector<8x96xf32> -> vector<8x96xf32>
      %c0_61 = arith.constant 0 : index
      %c0_62 = arith.constant 0 : index
      %110 = vector.load %arg4[%c0_61, %c0_62] : memref<1x96xf32, #tpu.memory_space<vmem>>, vector<1x96xf32>
      %111 = vector.broadcast %110 : vector<1x96xf32> to vector<8x96xf32>
      %112 = arith.addf %109, %111 : vector<8x96xf32>
      %113 = vector.extract_strided_slice %112 {offsets = [0, 0], sizes = [8, 32], strides = [1, 1]} : vector<8x96xf32> to vector<8x32xf32>
      %114 = vector.shape_cast %113 : vector<8x32xf32> to vector<8x4x8xf32>
      %115 = vector.extract_strided_slice %112 {offsets = [0, 32], sizes = [8, 32], strides = [1, 1]} : vector<8x96xf32> to vector<8x32xf32>
      %116 = vector.shape_cast %115 : vector<8x32xf32> to vector<8x4x8xf32>
      %117 = vector.extract_strided_slice %112 {offsets = [0, 64], sizes = [8, 32], strides = [1, 1]} : vector<8x96xf32> to vector<8x32xf32>
      %118 = vector.shape_cast %117 : vector<8x32xf32> to vector<8x4x8xf32>
      %119 = tpu.transpose %114, [1, 0, 2] : vector<8x4x8xf32> -> vector<4x8x8xf32>
      %120 = arith.truncf %119 : vector<4x8x8xf32> to vector<4x8x8xbf16>
      %c0_63 = arith.constant 0 : index
      %c0_64 = arith.constant 0 : index
      %c0_65 = arith.constant 0 : index
      %121 = vector.load %arg17[%c0_63, %c0_64, %c0_65] : memref<4x8x8xbf16, #tpu.memory_space<vmem>>, vector<4x8x8xbf16>
      tpu.vector_store %arg17[%c0_63, %c0_64, %c0_65], %120 {strides = array<i32>} : memref<4x8x8xbf16, #tpu.memory_space<vmem>>, vector<4x8x8xbf16>,
      %122 = tpu.transpose %116, [1, 0, 2] : vector<8x4x8xf32> -> vector<4x8x8xf32>
      %123 = arith.truncf %122 : vector<4x8x8xf32> to vector<4x8x8xbf16>
      %c0_66 = arith.constant 0 : index
      %c0_67 = arith.constant 0 : index
      %c0_68 = arith.constant 0 : index
      %124 = vector.load %arg18[%c0_66, %c0_67, %c0_68] : memref<4x8x8xbf16, #tpu.memory_space<vmem>>, vector<4x8x8xbf16>
      tpu.vector_store %arg18[%c0_66, %c0_67, %c0_68], %123 {strides = array<i32>} : memref<4x8x8xbf16, #tpu.memory_space<vmem>>, vector<4x8x8xbf16>,
      %125 = tpu.transpose %118, [1, 0, 2] : vector<8x4x8xf32> -> vector<4x8x8xf32>
      %126 = arith.truncf %125 : vector<4x8x8xf32> to vector<4x8x8xbf16>
      %c0_69 = arith.constant 0 : index
      %c0_70 = arith.constant 0 : index
      %c0_71 = arith.constant 0 : index
      %127 = vector.load %arg19[%c0_69, %c0_70, %c0_71] : memref<4x8x8xbf16, #tpu.memory_space<vmem>>, vector<4x8x8xbf16>
      tpu.vector_store %arg19[%c0_69, %c0_70, %c0_71], %126 {strides = array<i32>} : memref<4x8x8xbf16, #tpu.memory_space<vmem>>, vector<4x8x8xbf16>,
    } else {
    }
    %c8_i32 = arith.constant 8 : i32
    %3 = arith.muli %arg1, %c8_i32 : i32
    %4 = tpu.assume_multiple %3, 8 : i32
    %c0 = arith.constant 0 : index
    %5 = arith.index_cast %4 : i32 to index
    %c0_1 = arith.constant 0 : index
    %6 = vector.load %arg2[%c0, %5, %c0_1] : memref<1x8x32xf32, #tpu.memory_space<vmem>>, vector<1x8x32xf32>
    %7 = vector.shape_cast %6 : vector<1x8x32xf32> to vector<8x32xf32>
    %c0_2 = arith.constant 0 : index
    %8 = arith.index_cast %4 : i32 to index
    %c0_3 = arith.constant 0 : index
    %9 = vector.load %arg17[%c0_2, %8, %c0_3] : memref<4x8x8xbf16, #tpu.memory_space<vmem>>, vector<4x8x8xbf16>
    %c0_4 = arith.constant 0 : index
    %c0_5 = arith.constant 0 : index
    %c0_6 = arith.constant 0 : index
    %10 = vector.load %arg18[%c0_4, %c0_5, %c0_6] : memref<4x8x8xbf16, #tpu.memory_space<vmem>>, vector<4x8x8xbf16>
    "tpu.trace_start"() <{level = 10 : i32, message = "hqd,hkd->hqk"}> : () -> ()
    %cst = arith.constant dense<0.000000e+00> : vector<4x8x8xf32>
    %11 = tpu.matmul %9, %10, %cst {dimension_numbers = #tpu.dot_dimension_numbers<[2], [2], [1], [1], [0, 0, 0, 1, 1, 1], [0], [0]>} : vector<4x8x8xbf16>, vector<4x8x8xbf16>, vector<4x8x8xf32> -> vector<4x8x8xf32>
    "tpu.trace_stop"() : () -> ()
    %cst_7 = arith.constant 0.353553385 : f32
    %12 = vector.broadcast %cst_7 : f32 to vector<4x8x8xf32>
    %13 = arith.mulf %11, %12 : vector<4x8x8xf32>
    %cst_8 = arith.constant dense<0xFF800000> : vector<4x8xf32>
    %14 = vector.multi_reduction <maximumf>, %13, %cst_8 [2] : vector<4x8x8xf32> to vector<4x8xf32>
    %15 = vector.shape_cast %14 : vector<4x8xf32> to vector<4x8x1xf32>
    %16 = vector.broadcast %15 : vector<4x8x1xf32> to vector<4x8x8xf32>
    %17 = arith.subf %13, %16 : vector<4x8x8xf32>
    %18 = math.exp %17 : vector<4x8x8xf32>
    %cst_9 = arith.constant dense<0.000000e+00> : vector<4x8xf32>
    %19 = vector.multi_reduction <add>, %18, %cst_9 [2] : vector<4x8x8xf32> to vector<4x8xf32>
    %20 = vector.shape_cast %19 : vector<4x8xf32> to vector<4x8x1xf32>
    %21 = tpu.reciprocal %20 : vector<4x8x1xf32> -> vector<4x8x1xf32>
    %22 = vector.broadcast %21 : vector<4x8x1xf32> to vector<4x8x8xf32>
    %23 = arith.mulf %18, %22 : vector<4x8x8xf32>
    %24 = vector.shape_cast %23 : vector<4x8x8xf32> to vector<4x1x8x8xf32>
    %25 = arith.truncf %24 : vector<4x1x8x8xf32> to vector<4x1x8x8xbf16>
    %c0_10 = arith.constant 0 : index
    %c0_11 = arith.constant 0 : index
    %c0_12 = arith.constant 0 : index
    %c0_13 = arith.constant 0 : index
    %26 = vector.load %arg16[%c0_10, %c0_11, %c0_12, %c0_13] : memref<4x1x8x8xbf16, #tpu.memory_space<vmem>>, vector<4x1x8x8xbf16>
    tpu.vector_store %arg16[%c0_10, %c0_11, %c0_12, %c0_13], %25 {strides = array<i32>} : memref<4x1x8x8xbf16, #tpu.memory_space<vmem>>, vector<4x1x8x8xbf16>,
    %27 = arith.truncf %23 : vector<4x8x8xf32> to vector<4x8x8xbf16>
    %c0_14 = arith.constant 0 : index
    %c0_15 = arith.constant 0 : index
    %c0_16 = arith.constant 0 : index
    %28 = vector.load %arg19[%c0_14, %c0_15, %c0_16] : memref<4x8x8xbf16, #tpu.memory_space<vmem>>, vector<4x8x8xbf16>
    "tpu.trace_start"() <{level = 10 : i32, message = "hqk,hkd->hqd"}> : () -> ()
    %cst_17 = arith.constant dense<0.000000e+00> : vector<4x8x8xf32>
    %29 = tpu.matmul %27, %28, %cst_17 {dimension_numbers = #tpu.dot_dimension_numbers<[2], [1], [1], [2], [0, 0, 0, 1, 1, 2], [0], [0]>} : vector<4x8x8xbf16>, vector<4x8x8xbf16>, vector<4x8x8xf32> -> vector<4x8x8xf32>
    "tpu.trace_stop"() : () -> ()
    %30 = tpu.transpose %29, [1, 0, 2] : vector<4x8x8xf32> -> vector<8x4x8xf32>
    %31 = vector.shape_cast %30 : vector<8x4x8xf32> to vector<8x32xf32>
    %32 = arith.truncf %31 : vector<8x32xf32> to vector<8x32xbf16>
    %c0_18 = arith.constant 0 : index
    %c0_19 = arith.constant 0 : index
    %33 = vector.load %arg5[%c0_18, %c0_19] : memref<32x32xbf16, #tpu.memory_space<vmem>>, vector<32x32xbf16>
    %cst_20 = arith.constant dense<0.000000e+00> : vector<8x32xf32>
    %34 = tpu.matmul %32, %33, %cst_20 {dimension_numbers = #tpu.dot_dimension_numbers<[1], [0], [0], [1], [0, 0, 1, 1], [], []>} : vector<8x32xbf16>, vector<32x32xbf16>, vector<8x32xf32> -> vector<8x32xf32>
    %c0_21 = arith.constant 0 : index
    %c0_22 = arith.constant 0 : index
    %35 = vector.load %arg6[%c0_21, %c0_22] : memref<1x32xf32, #tpu.memory_space<vmem>>, vector<1x32xf32>
    %36 = vector.broadcast %35 : vector<1x32xf32> to vector<8x32xf32>
    %37 = arith.addf %34, %36 : vector<8x32xf32>
    %38 = arith.addf %37, %7 : vector<8x32xf32>
    %c0_23 = arith.constant 0 : index
    %c0_24 = arith.constant 0 : index
    %39 = vector.load %arg7[%c0_23, %c0_24] : memref<1x32xf32, #tpu.memory_space<vmem>>, vector<1x32xf32>
    %c0_25 = arith.constant 0 : index
    %c0_26 = arith.constant 0 : index
    %40 = vector.load %arg8[%c0_25, %c0_26] : memref<1x32xf32, #tpu.memory_space<vmem>>, vector<1x32xf32>
    %cst_27 = arith.constant dense<0.000000e+00> : vector<8xf32>
    %41 = vector.multi_reduction <add>, %38, %cst_27 [1] : vector<8x32xf32> to vector<8xf32>
    %42 = vector.shape_cast %41 : vector<8xf32> to vector<8x1xf32>
    %cst_28 = arith.constant 3.200000e+01 : f32
    %43 = vector.broadcast %cst_28 : f32 to vector<8x1xf32>
    %44 = arith.divf %42, %43 : vector<8x1xf32>
    %45 = vector.broadcast %44 : vector<8x1xf32> to vector<8x32xf32>
    %46 = arith.subf %38, %45 : vector<8x32xf32>
    %47 = arith.mulf %46, %46 : vector<8x32xf32>
    %cst_29 = arith.constant dense<0.000000e+00> : vector<8xf32>
    %48 = vector.multi_reduction <add>, %47, %cst_29 [1] : vector<8x32xf32> to vector<8xf32>
    %49 = vector.shape_cast %48 : vector<8xf32> to vector<8x1xf32>
    %cst_30 = arith.constant 3.200000e+01 : f32
    %50 = vector.broadcast %cst_30 : f32 to vector<8x1xf32>
    %51 = arith.divf %49, %50 : vector<8x1xf32>
    %52 = vector.broadcast %44 : vector<8x1xf32> to vector<8x32xf32>
    %53 = arith.subf %38, %52 : vector<8x32xf32>
    %cst_31 = arith.constant 9.99999974E-6 : f32
    %54 = vector.broadcast %cst_31 : f32 to vector<8x1xf32>
    %55 = arith.addf %51, %54 : vector<8x1xf32>
    %56 = math.rsqrt %55 : vector<8x1xf32>
    %57 = vector.broadcast %56 : vector<8x1xf32> to vector<8x32xf32>
    %58 = arith.mulf %53, %57 : vector<8x32xf32>
    %59 = vector.broadcast %39 : vector<1x32xf32> to vector<8x32xf32>
    %60 = arith.mulf %58, %59 : vector<8x32xf32>
    %61 = vector.broadcast %40 : vector<1x32xf32> to vector<8x32xf32>
    %62 = arith.addf %60, %61 : vector<8x32xf32>
    %63 = arith.truncf %62 : vector<8x32xf32> to vector<8x32xbf16>
    %c0_32 = arith.constant 0 : index
    %c0_33 = arith.constant 0 : index
    %64 = vector.load %arg9[%c0_32, %c0_33] : memref<32x64xbf16, #tpu.memory_space<vmem>>, vector<32x64xbf16>
    %cst_34 = arith.constant dense<0.000000e+00> : vector<8x64xf32>
    %65 = tpu.matmul %63, %64, %cst_34 {dimension_numbers = #tpu.dot_dimension_numbers<[1], [0], [0], [1], [0, 0, 1, 1], [], []>} : vector<8x32xbf16>, vector<32x64xbf16>, vector<8x64xf32> -> vector<8x64xf32>
    %c0_35 = arith.constant 0 : index
    %c0_36 = arith.constant 0 : index
    %66 = vector.load %arg10[%c0_35, %c0_36] : memref<1x64xf32, #tpu.memory_space<vmem>>, vector<1x64xf32>
    %67 = vector.broadcast %66 : vector<1x64xf32> to vector<8x64xf32>
    %68 = arith.addf %65, %67 : vector<8x64xf32>
    %cst_37 = arith.constant 0.000000e+00 : f32
    %69 = vector.broadcast %cst_37 : f32 to vector<8x64xf32>
    %70 = arith.maximumf %68, %69 : vector<8x64xf32>
    %71 = arith.truncf %70 : vector<8x64xf32> to vector<8x64xbf16>
    %c0_38 = arith.constant 0 : index
    %c0_39 = arith.constant 0 : index
    %72 = vector.load %arg11[%c0_38, %c0_39] : memref<64x32xbf16, #tpu.memory_space<vmem>>, vector<64x32xbf16>
    %cst_40 = arith.constant dense<0.000000e+00> : vector<8x32xf32>
    %73 = tpu.matmul %71, %72, %cst_40 {dimension_numbers = #tpu.dot_dimension_numbers<[1], [0], [0], [1], [0, 0, 1, 1], [], []>} : vector<8x64xbf16>, vector<64x32xbf16>, vector<8x32xf32> -> vector<8x32xf32>
    %c0_41 = arith.constant 0 : index
    %c0_42 = arith.constant 0 : index
    %74 = vector.load %arg12[%c0_41, %c0_42] : memref<1x32xf32, #tpu.memory_space<vmem>>, vector<1x32xf32>
    %75 = vector.broadcast %74 : vector<1x32xf32> to vector<8x32xf32>
    %76 = arith.addf %73, %75 : vector<8x32xf32>
    %77 = arith.addf %76, %62 : vector<8x32xf32>
    %c0_43 = arith.constant 0 : index
    %c0_44 = arith.constant 0 : index
    %78 = vector.load %arg13[%c0_43, %c0_44] : memref<1x32xf32, #tpu.memory_space<vmem>>, vector<1x32xf32>
    %c0_45 = arith.constant 0 : index
    %c0_46 = arith.constant 0 : index
    %79 = vector.load %arg14[%c0_45, %c0_46] : memref<1x32xf32, #tpu.memory_space<vmem>>, vector<1x32xf32>
    %cst_47 = arith.constant dense<0.000000e+00> : vector<8xf32>
    %80 = vector.multi_reduction <add>, %77, %cst_47 [1] : vector<8x32xf32> to vector<8xf32>
    %81 = vector.shape_cast %80 : vector<8xf32> to vector<8x1xf32>
    %cst_48 = arith.constant 3.200000e+01 : f32
    %82 = vector.broadcast %cst_48 : f32 to vector<8x1xf32>
    %83 = arith.divf %81, %82 : vector<8x1xf32>
    %84 = vector.broadcast %83 : vector<8x1xf32> to vector<8x32xf32>
    %85 = arith.subf %77, %84 : vector<8x32xf32>
    %86 = arith.mulf %85, %85 : vector<8x32xf32>
    %cst_49 = arith.constant dense<0.000000e+00> : vector<8xf32>
    %87 = vector.multi_reduction <add>, %86, %cst_49 [1] : vector<8x32xf32> to vector<8xf32>
    %88 = vector.shape_cast %87 : vector<8xf32> to vector<8x1xf32>
    %cst_50 = arith.constant 3.200000e+01 : f32
    %89 = vector.broadcast %cst_50 : f32 to vector<8x1xf32>
    %90 = arith.divf %88, %89 : vector<8x1xf32>
    %91 = vector.broadcast %83 : vector<8x1xf32> to vector<8x32xf32>
    %92 = arith.subf %77, %91 : vector<8x32xf32>
    %cst_51 = arith.constant 9.99999974E-6 : f32
    %93 = vector.broadcast %cst_51 : f32 to vector<8x1xf32>
    %94 = arith.addf %90, %93 : vector<8x1xf32>
    %95 = math.rsqrt %94 : vector<8x1xf32>
    %96 = vector.broadcast %95 : vector<8x1xf32> to vector<8x32xf32>
    %97 = arith.mulf %92, %96 : vector<8x32xf32>
    %98 = vector.broadcast %78 : vector<1x32xf32> to vector<8x32xf32>
    %99 = arith.mulf %97, %98 : vector<8x32xf32>
    %100 = vector.broadcast %79 : vector<1x32xf32> to vector<8x32xf32>
    %101 = arith.addf %99, %100 : vector<8x32xf32>
    %c0_52 = arith.constant 0 : index
    %c0_53 = arith.constant 0 : index
    %c0_54 = arith.constant 0 : index
    %102 = vector.load %arg15[%c0_52, %c0_53, %c0_54] : memref<1x8x32xf32, #tpu.memory_space<vmem>>, vector<1x8x32xf32>
    %103 = vector.shape_cast %102 : vector<1x8x32xf32> to vector<8x32xf32>
    %104 = vector.shape_cast %101 : vector<8x32xf32> to vector<1x8x32xf32>
    tpu.vector_store %arg15[%c0_52, %c0_53, %c0_54], %104 {strides = array<i32>} : memref<1x8x32xf32, #tpu.memory_space<vmem>>, vector<1x8x32xf32>,
    return
  }
  func.func @transform_0(%arg0: i32, %arg1: i32) -> (i32, i32, i32) {
    %c0_i32 = arith.constant 0 : i32
    %c0_i32_0 = arith.constant 0 : i32
    %c0_i32_1 = arith.constant 0 : i32
    return %arg0, %c0_i32, %c0_i32_0 : i32, i32, i32
  }
  func.func @transform_1(%arg0: i32, %arg1: i32) -> (i32, i32) {
    %c0_i32 = arith.constant 0 : i32
    %c0_i32_0 = arith.constant 0 : i32
    %c0_i32_1 = arith.constant 0 : i32
    return %c0_i32, %c0_i32_0 : i32, i32
  }
  func.func @transform_2(%arg0: i32, %arg1: i32) -> (i32, i32) {
    %c0_i32 = arith.constant 0 : i32
    %c0_i32_0 = arith.constant 0 : i32
    %c0_i32_1 = arith.constant 0 : i32
    return %c0_i32, %c0_i32_0 : i32, i32
  }
  func.func @transform_3(%arg0: i32, %arg1: i32) -> (i32, i32) {
    %c0_i32 = arith.constant 0 : i32
    %c0_i32_0 = arith.constant 0 : i32
    %c0_i32_1 = arith.constant 0 : i32
    return %c0_i32, %c0_i32_0 : i32, i32
  }
  func.func @transform_4(%arg0: i32, %arg1: i32) -> (i32, i32) {
    %c0_i32 = arith.constant 0 : i32
    %c0_i32_0 = arith.constant 0 : i32
    %c0_i32_1 = arith.constant 0 : i32
    return %c0_i32, %c0_i32_0 : i32, i32
  }
  func.func @transform_5(%arg0: i32, %arg1: i32) -> (i32, i32) {
    %c0_i32 = arith.constant 0 : i32
    %c0_i32_0 = arith.constant 0 : i32
    %c0_i32_1 = arith.constant 0 : i32
    return %c0_i32, %c0_i32_0 : i32, i32
  }
  func.func @transform_6(%arg0: i32, %arg1: i32) -> (i32, i32) {
    %c0_i32 = arith.constant 0 : i32
    %c0_i32_0 = arith.constant 0 : i32
    %c0_i32_1 = arith.constant 0 : i32
    return %c0_i32, %c0_i32_0 : i32, i32
  }
  func.func @transform_7(%arg0: i32, %arg1: i32) -> (i32, i32) {
    %c0_i32 = arith.constant 0 : i32
    %c0_i32_0 = arith.constant 0 : i32
    %c0_i32_1 = arith.constant 0 : i32
    return %c0_i32, %c0_i32_0 : i32, i32
  }
  func.func @transform_8(%arg0: i32, %arg1: i32) -> (i32, i32) {
    %c0_i32 = arith.constant 0 : i32
    %c0_i32_0 = arith.constant 0 : i32
    %c0_i32_1 = arith.constant 0 : i32
    return %c0_i32, %c0_i32_0 : i32, i32
  }
  func.func @transform_9(%arg0: i32, %arg1: i32) -> (i32, i32) {
    %c0_i32 = arith.constant 0 : i32
    %c0_i32_0 = arith.constant 0 : i32
    %c0_i32_1 = arith.constant 0 : i32
    return %c0_i32, %c0_i32_0 : i32, i32
  }
  func.func @transform_10(%arg0: i32, %arg1: i32) -> (i32, i32) {
    %c0_i32 = arith.constant 0 : i32
    %c0_i32_0 = arith.constant 0 : i32
    %c0_i32_1 = arith.constant 0 : i32
    return %c0_i32, %c0_i32_0 : i32, i32
  }
  func.func @transform_11(%arg0: i32, %arg1: i32) -> (i32, i32) {
    %c0_i32 = arith.constant 0 : i32
    %c0_i32_0 = arith.constant 0 : i32
    %c0_i32_1 = arith.constant 0 : i32
    return %c0_i32, %c0_i32_0 : i32, i32
  }
  func.func @transform_12(%arg0: i32, %arg1: i32) -> (i32, i32) {
    %c0_i32 = arith.constant 0 : i32
    %c0_i32_0 = arith.constant 0 : i32
    %c0_i32_1 = arith.constant 0 : i32
    return %c0_i32, %c0_i32_0 : i32, i32
  }
  func.func @transform_13(%arg0: i32, %arg1: i32) -> (i32, i32, i32) {
    %c0_i32 = arith.constant 0 : i32
    %c0_i32_0 = arith.constant 0 : i32
    return %arg0, %arg1, %c0_i32 : i32, i32, i32
  }
  func.func @transform_14(%arg0: i32, %arg1: i32) -> (i32, i32, i32, i32) {
    %c0_i32 = arith.constant 0 : i32
    %c0_i32_0 = arith.constant 0 : i32
    %c0_i32_1 = arith.constant 0 : i32
    return %c0_i32, %arg0, %arg1, %c0_i32_0 : i32, i32, i32, i32
  }
}

</mosaic_0001>

<bundles_post_ra>
// kernel: tpu_custom_call.1
= control target key start
LH: loop header
LB: loop body
LE: loop exit
PB: predicated region body
PF: predicated region fallthrough
CT: control target
= control target key end

     0   :  { %s3057_s0 = inlined_call_operand.vmem [shape: f32[2,8,32], index: 0, kind: input, shape index: {}]   ;;  %s3058_s1 = inlined_call_operand.vmem [shape: bf16[32,96], index: 1, kind: input, shape index: {}]   ;;  %s3059_s2 = inlined_call_operand.vmem [shape: f32[1,96], index: 2, kind: input, shape index: {}]   ;;  %s3060_s3 = inlined_call_operand.vmem [shape: bf16[32,32], index: 3, kind: input, shape index: {}]   ;;  %s3061_s4 = inlined_call_operand.vmem [shape: f32[1,32], index: 4, kind: input, shape index: {}]   ;;  %s3062_s5 = inlined_call_operand.vmem [shape: f32[1,32], index: 5, kind: input, shape index: {}]   ;;  %s3063_s6 = inlined_call_operand.vmem [shape: f32[1,32], index: 6, kind: input, shape index: {}]   ;;  %s3064_s7 = inlined_call_operand.hbm [shape: bf16[32,64], index: 7, kind: input, shape index: {}]   ;;  %s3065_s8 = inlined_call_operand.vmem [shape: f32[1,64], index: 8, kind: input, shape index: {}]   ;;  %s3066_s9 = inlined_call_operand.vmem [shape: bf16[64,32], index: 9, kind: input, shape index: {}]   ;;  %s3067_s10 = inlined_call_operand.vmem [shape: f32[1,32], index: 10, kind: input, shape index: {}]   ;;  %s3068_s11 = inlined_call_operand.vmem [shape: f32[1,32], index: 11, kind: input, shape index: {}]   ;;  %s3069_s12 = inlined_call_operand.vmem [shape: f32[1,32], index: 12, kind: input, shape index: {}]   ;;  %s3070_s13 = inlined_call_operand.hbm [shape: f32[2,8,32], index: 13, kind: output, shape index: {0}]   ;;  %s3071_s14 = inlined_call_operand.hbm [shape: bf16[4,2,8,8], index: 14, kind: output, shape index: {1}]  }
   0x1   :  { %3081 = sst [smem:[#allocation20_spill]] %s3057_s0 }
   0x2   :  { %3082 = sst [smem:[#allocation21_spill]] %s3058_s1 }
   0x3   :  { %20 = vsyncpa [#allocation6], 0 }
   0x4   :  { %21 = vsyncpa [#allocation7], 0 }
   0x5   :  { %23 = vsyncpa [#allocation7 + $0x1], 0 }
   0x6   :  { %24 = vsyncpa [#allocation10], 0 }
   0x7   :  { %26 = vsyncpa [#allocation10 + $0x1], 0  ;;  %s2603_s29 = smov 0   ;;  %s2605_s30 = smov 0  }
   0x8   :  { %s2607_s15 = smov 0   ;;  %s2609_s16 = smov 0  }
   0x9   :  { %s2611_s17 = smov 0   ;;  %s2613_s18 = smov 0  }
   0xa LB: > { %3083 = sst [smem:[#allocation14_spill]] %s2487_s29  ;;  %s2080_s19 = sadd.s32 4294967295, %s2507_s18   ;;  %s2507_s18 = sphi %s2613_s18, %s32_s18   ;;  %s2503_s17 = sphi %s2611_s17, %s3106_s17   ;;  %s2499_s16 = sphi %s2609_s16, %s3105_s16   ;;  %s2495_s15 = sphi %s2607_s15, %s3104_s15   ;;  %s2491_s30 = sphi %s2605_s30, %s3108_s30   ;;  %s2487_s29 = sphi %s2603_s29, %s3107_s29  }
   0xb   : > { %3084 = sst [smem:[#allocation15_spill]] %s2495_s15  ;;  %s2081_s20 = sadd.s32 4294967294, %s2507_s18  }
   0xc   : > { %3085 = sst [smem:[#allocation16_spill]] %s2503_s17  ;;  %s44_s21 = sadd.s32 1, %s2503_s17 }
   0xd   : > { %s331_s22 = sadd.s32 1, %s2495_s15  ;;  %p46_p0 = scmp.ge.s32.totalorder %s44_s21, 2 }
   0xe   : > { %p341_p1 = scmp.ne.s32.totalorder %s2495_s15, %s2491_s30  ;;  %p342_p2 = scmp.eq.s32.totalorder %s2080_s19, 1 }
   0xf   : > { %p347_p3 = scmp.ne.s32.totalorder %s2491_s30, %s2487_s29  ;;  %s3110_s21 = smov (%p46_p0, %s44_s21), 0 }
  0x10   : > { %3086 = sst [smem:[#allocation17_spill]] %s3110_s21  ;;  %p2643_p4 = por %p342_p2, %p341_p1 }
  0x11   : > { %p348_p5 = scmp.eq.s32.totalorder %s2081_s20, 1  ;;  %s326_s24 = ssub.s32 %s2503_s17, %s3110_s21 }
  0x12   : > { %s3087_s23 = scalar_select %p2643_p4, 1, 0 }
  0x13   : > { %p2082_p6 = scmp.ge.s32.totalorder %s2507_s18, 1  ;;  %p329_p7 = scmp.eq.s32.totalorder %s326_s24, 0 }
  0x14   : > { %p2650_p8 = por %p348_p5, %p347_p3  ;;  %p383_p9 = scmp.lt.s32.totalorder %s2507_s18, 3 }
  0x15   : > { %s2656_s26 = scalar_select %p329_p7, %s2495_s15, %s331_s22  }
  0x16   : > { %s3088_s25 = scalar_select %p2650_p8, 1, 0 }
  0x17   : > { %3090 = sst [smem:[#allocation19_spill]] %s2656_s26  ;;  %p2658_p10 = pnand %p2082_p6, %p383_p9 }
  0x18   : > { %3089 = sst [smem:[#allocation18_spill]] %s3088_s25  ;;  %p2662_p11 = scmp.eq.s32.totalorder %s2080_s19, 0 }
  0x19   : > { %s3091_s27 = scalar_select %p2658_p10, 1, 0 }
  0x1a   : > { %s3092_s28 = scalar_select %p2662_p11, 1, 0 }
  0x1b   : > { %p2256_p12 = pneg %p2658_p10  ;;  %s2509_s20 = smov [#allocation5]  }
  0x1c   : > { %s413_s24 = sshll.u32 %s2509_s20, 4  ;;  %s2365_s26 = scalar_lea.hbm %s3064_s7, 256  ;;  %s414_s24 = int_to_ptr.vmem [resolvable:$true] %s413_s24 }
  0x1d   : > { %p2670_p13 = pnand %p2662_p11, %p2256_p12  ;;  %p2366_p0 = scmp.ne.s32.totalorder %s3064_s7, %s2365_s26 }
  0x1e   : > { %p2372_p5 = scmp.lt.u32.totalorder %s2365_s26, %s3064_s7 }
  0x1f   : > { %p2367_p1 = pneg %p2670_p13 }
  0x21   : > { %p2368_p2 = pnand %p2367_p1, %p2366_p0 }
  0x23   : > { %p2369_p3 = pneg %p2368_p2 }
  0x25   : > { %p2374_p6 = pnand %p2372_p5, %p2369_p3 }
  0x27   : > { %2377 = shalt.err (!%p2374_p6)
}
  0x28   : > { %s2378_s29 = scalar_lea.vmem %s414_s24, 256  ;;  %p2386_p8 = scmp.lt.s32.totalorder %s414_s24, %s414_s24 }
  0x29   : > { %p2379_p7 = scmp.ne.s32.totalorder %s414_s24, %s2378_s29  ;;  %p2387_p4 = scmp.lt.s32.totalorder %s2378_s29, %s2378_s29 }
  0x2b   : > { %p2381_p9 = pnand %p2379_p7, %p2367_p1  ;;  %p2388_p11 = por %p2387_p4, %p2386_p8 }
  0x2d   : > { %p2382_p12 = pneg %p2381_p9 }
  0x2f   : > { %p2389_p10 = pnand %p2388_p11, %p2382_p12 }
  0x31   : > { %2392 = shalt.err (!%p2389_p10)
}
  0x32   : > { %s2510_s15 = smov 64   ;;  %s2511_s17 = smov 4  }
  0x33   : > { %2259 = dma.hbm_to_vmem [thread:$0]  (!%p2670_p13), %s3064_s7, 256, %s414_s24, [#allocation6], %s2510_s15, %s2510_s15, %s2511_s17  }
  0x34   : > { %p3094_p0 = scmp.ne.s32.totalorder %s3091_s27, 0 }
  0x35   : > { %p3095_p2 = scmp.ne.s32.totalorder (!%p3094_p0), %s3092_s28, 0 }
  0x36   : > { %451 = sbr.rel (%p3094_p0) target bundleno = 2745 (0xab9), region = 72 }
  0x3d   : > { %2474 = dma.done.wait (%p3095_p2), [#allocation6], 256  }
  0x3e   : > { %2476 = vsyncadd (%p3095_p2), [#allocation6], 4294967040  ;;  %p501_p4 = scmp.lt.s32.totalorder %s2499_s16, 1  ;;  %v2512_v0 = vmov 0.0   ;;  %vm2513_vm0 = vmmov 0   ;;  %s3096_s0 = sld [smem:[#allocation20_spill]]  ;;  %v594_v13 = vlaneseq }
  0x3f   : > { %2164 = vmatprep.subr.bf16.mxu0 %v2512_v0  ;;  %2168 = vmatprep.mubr.msk.bf16.mxu0 %vm2513_vm0, %v2512_v0  ;;  %s3097_s1 = sld [smem:[#allocation21_spill]]  ;;  %vm535_vm1 = vcmask 261120   ;;  %v2090_v5 = vld [vmem:[%s3059_s2] ss:$0 sm:$0xff]  ;;  %s2514_s19 = smov 104   ;;  %vm889_vm2 = vcmask 60416  }
  0x40   : > { %s502_s29 = scalar_select %p501_p4, %s2499_s16, 1  ;;  %2172 = vmatprep.subr.bf16.mxu1 %v2512_v0  ;;  %2174 = vmatprep.mubr.msk.bf16.mxu1 %vm2513_vm0, %v2512_v0  ;;  %v2518_v11 = vmov 1983009808   ;;  %v2519_v14 = vmov 1934713408   ;;  %v595_v17 = vshrl.u32 %v594_v13, 7 }
  0x41   : > { %s2517_s25 = smov 112   ;;  %v592_v12 = vunpack.c.l.s4 %v2518_v11  ;;  %v624_v15 = vunpack.c.l.s4 %v2519_v14  ;;  %vm1061_vm3 = vcmask 64512   ;;  %s2520_s26 = smov 64   ;;  %vm1310_vm4 = vcmask 1043456  }
  0x42   : > { %s2089_s21 = sshll.u32 %s502_s29, 3  ;;  %s2515_s29 = smov 120   ;;  %vm1641_vm5 = vcmask 130048   ;;  %vm1643_vm6 = vcmask 195584   ;;  %vm1852_vm7 = vcmask 523264  }
  0x43   : > { %v593_v16 = vunpack.c.0.s8 %v592_v12  ;;  %v625_v20 = vunpack.c.0.s8 %v624_v15  ;;  %p3098_p10 = scmp.ne.s32.totalorder %s3087_s23, 0 }
  0x44   : > { %s504_s27 = scalar_lea.vmem %s3096_s0, %s2089_s21  ;;  %s2516_s21 = smov 96  }
  0x45   : > { %v2335_v1 = vld [vmem:[%s3097_s1] sm:$0xff]   ;;  %v2336_v2 = vld [vmem:[%s3097_s1 + $0x8] sm:$0xff]   ;;  %v2736_v21 = vsub.s32 %v593_v16, %v595_v17  ;;  %v2750_v27 = vsub.s32 %v625_v20, %v595_v17 }
  0x46   : > { %2165 = vmatpush3.bf16.msra.mxu0 %v2335_v1  ;;  %v2713_v3 = vld [vmem:[%s504_s27] sm:$0xff]  ;;  %s2865_s27 = sand.u32 1, %s2491_s30  }
  0x47   : > { %2166 = vmatprep.subr.bf16.mxu0 %v2512_v0  ;;  %v511_v4 = vpack.c.bf16 %v2713_v3, %v2713_v3  ;;  %s2088_s28 = sshll.u32 %s2865_s27, 4 }
  0x48   : > { %s2872_s24 = scalar_lea.vmem [#allocation9], %s2088_s28  ;;  %s2131_s28 = sshll.u32 %s2499_s16, 6 }
  0x49   : > { %s2970_s17 = scalar_lea.hbm %s3071_s14, %s2131_s28 }
  0x4a   : > { %2167 = vmatpush3.bf16.msra.mxu0 %v2336_v2 }
  0x4b   : > { %2178 = vmatprep.subr.bf16.mxu0 %v2512_v0 }
  0x4d   : > { %2169 = vmatmul.mubr.msk.bf16.vlgmr.msra.gmra.mrb[0].mxu0 %vm535_vm1, %v511_v4 }
  0x4e   : > { %2180 = vmatprep.mubr.msk.bf16.mxu0 %vm2513_vm0, %v2512_v0 }
 0x120   : > { %v573_v6 = vpop.f32.mrb[0].mxu0 }
 0x121   : > { %v2725_v7 = vadd.f32 %v2090_v5, %v573_v6  ;;  %v2170_v8 = vpop.f32.mrb[1].mxu0 }
 0x122   : > { %v576_v9 = vpop.f32.mrb[2].mxu0 }
 0x123   : > { %586 = vrot.lane.b32.xlu1 %v2725_v7, %s2514_s19  ;;  %580 = vrot.lane.b32.xlu0 %v2725_v7, %s2515_s29  ;;  %v2171_v10 = vpop.f32.mrb[3].mxu0  ;;  %s2521_s19 = smov 16   ;;  %s2522_s29 = smov 8  }
 0x127   : > { %657 = vrot.lane.b32.xlu1 %v2725_v7, %s2516_s21  ;;  %583 = vrot.lane.b32.xlu0 %v2725_v7, %s2517_s25  ;;  %s1960_s25 = sshll.u32 %s2872_s24, 4  ;;  %s2965_s25 = int_to_ptr.vmem [resolvable:$true] %s1960_s25 }
 0x195   : > { %v2731_v18 = vpop.permute.xlu1 %586  ;;  %v2733_v19 = vpop.permute.xlu0 %580 }
 0x196   : > { %659 = vrot.lane.b32.xlu0 %v2733_v19, %s2516_s21  ;;  %v605_v22 = vcombine.low %v2733_v19, %v2731_v18  ;;  %v606_v23 = vcombine.high %v2733_v19, %v2731_v18 }
 0x198   : > { %v613_v28 = vrot.slane %v605_v22, %v2736_v21  ;;  %v620_v29 = vrot.slane %v606_v23, %v2736_v21 }
 0x199   : > { %v2742_v24 = vpop.permute.xlu0 %583  ;;  %v658_v1 = vpop.permute.xlu1 %657 }
 0x19a   : > { %v589_v25 = vcombine.low %v2725_v7, %v2742_v24  ;;  %v590_v26 = vcombine.high %v2725_v7, %v2742_v24  ;;  %663 = vrot.lane.b32.xlu0 %v2731_v18, %s2516_s21  ;;  %661 = vrot.lane.b32.xlu1 %v2742_v24, %s2516_s21  ;;  %s2523_s21 = smov 24  }
 0x19c   : > { %v597_v30 = vrot.slane %v589_v25, %v2736_v21  ;;  %v604_v31 = vrot.slane %v590_v26, %v2736_v21 }
 0x19e   : > { %v621_v32 = vcombine.low %v597_v30, %v613_v28  ;;  %v622_v33 = vcombine.high %v597_v30, %v613_v28  ;;  %v637_v34 = vcombine.low %v604_v31, %v620_v29  ;;  %v638_v35 = vcombine.high %v604_v31, %v620_v29 }
 0x1a0   : > { %v629_v36 = vrot.slane %v621_v32, %v2750_v27  ;;  %v636_v37 = vrot.slane %v622_v33, %v2750_v27  ;;  %v645_v38 = vrot.slane %v637_v34, %v2750_v27  ;;  %v652_v39 = vrot.slane %v638_v35, %v2750_v27 }
 0x1a2   : > { %v817_v40 = vcombine.low %v629_v36, %v636_v37  ;;  %v2094_v41 = vcombine.high %v629_v36, %v636_v37  ;;  %v833_v42 = vcombine.low %v645_v38, %v652_v39  ;;  %v2095_v43 = vcombine.high %v645_v38, %v652_v39 }
 0x1a4   : > { %v824_v44 = vrot.slane %v817_v40, %v2736_v21  ;;  %v832_v45 = vrot.slane %v2094_v41, %v2736_v21  ;;  %v840_v46 = vrot.slane %v833_v42, %v2736_v21  ;;  %v848_v47 = vrot.slane %v2095_v43, %v2736_v21 }
 0x1a6   : > { %v849_v48 = vcombine.low %v824_v44, %v832_v45  ;;  %v850_v49 = vcombine.high %v824_v44, %v832_v45  ;;  %v865_v50 = vcombine.low %v840_v46, %v848_v47  ;;  %v866_v51 = vcombine.high %v840_v46, %v848_v47 }
 0x1a8   : > { %v857_v52 = vrot.slane %v849_v48, %v2750_v27  ;;  %v864_v53 = vrot.slane %v850_v49, %v2750_v27  ;;  %v873_v54 = vrot.slane %v865_v50, %v2750_v27  ;;  %v880_v55 = vrot.slane %v866_v51, %v2750_v27 }
 0x1aa   : > { %v881_v56 = vcombine.low %v857_v52, %v873_v54  ;;  %v882_v57 = vcombine.high %v857_v52, %v873_v54  ;;  %v883_v58 = vcombine.low %v864_v53, %v880_v55  ;;  %v884_v59 = vcombine.high %v864_v53, %v880_v55 }
 0x1ac   : > { %v885_v60 = vpack.c.bf16 %v881_v56, %v881_v56  ;;  %v886_v61 = vpack.c.bf16 %v882_v57, %v882_v57  ;;  %v887_v62 = vpack.c.bf16 %v883_v58, %v883_v58  ;;  %v888_v63 = vpack.c.bf16 %v884_v59, %v884_v59 }
 0x1ae   : > { %890 = vst.msk [vmem:[#allocation2] sm:$0xf] %vm889_vm2, %v885_v60  ;;  %891 = vst.msk [vmem:[#allocation2 + $0x4] sm:$0xf] %vm889_vm2, %v886_v61 }
 0x1af   : > { %892 = vst.msk [vmem:[#allocation2 + $0x8] sm:$0xf] %vm889_vm2, %v887_v62  ;;  %893 = vst.msk [vmem:[#allocation2 + $0xc] sm:$0xf] %vm889_vm2, %v888_v63 }
 0x1b5   : > { %v1053_v58 = vld [vmem:[#allocation2] sm:$0xf]  ;;  %v1054_v59 = vld [vmem:[#allocation2 + $0x4] sm:$0xf] }
 0x1b6   : > { %v1055_v62 = vld [vmem:[#allocation2 + $0x8] sm:$0xf]  ;;  %v1056_v63 = vld [vmem:[#allocation2 + $0xc] sm:$0xf] }
 0x208   : > { %v660_v2 = vpop.permute.xlu0 %659 }
 0x20c   : > { %v662_v4 = vpop.permute.xlu1 %661  ;;  %v664_v5 = vpop.permute.xlu0 %663 }
 0x20d   : > { %v669_v6 = vcombine.low %v658_v1, %v662_v4  ;;  %v670_v8 = vcombine.high %v658_v1, %v662_v4  ;;  %v685_v9 = vcombine.low %v660_v2, %v664_v5  ;;  %v686_v10 = vcombine.high %v660_v2, %v664_v5 }
 0x20f   : > { %v677_v11 = vrot.slane %v669_v6, %v2736_v21  ;;  %v684_v12 = vrot.slane %v670_v8, %v2736_v21  ;;  %v693_v13 = vrot.slane %v685_v9, %v2736_v21  ;;  %v700_v14 = vrot.slane %v686_v10, %v2736_v21 }
 0x211   : > { %v701_v15 = vcombine.low %v677_v11, %v693_v13  ;;  %v702_v16 = vcombine.high %v677_v11, %v693_v13  ;;  %v717_v17 = vcombine.low %v684_v12, %v700_v14  ;;  %v718_v20 = vcombine.high %v684_v12, %v700_v14 }
 0x213   : > { %v709_v22 = vrot.slane %v701_v15, %v2750_v27  ;;  %v716_v23 = vrot.slane %v702_v16, %v2750_v27  ;;  %v725_v25 = vrot.slane %v717_v17, %v2750_v27  ;;  %v732_v26 = vrot.slane %v718_v20, %v2750_v27 }
 0x215   : > { %v894_v28 = vcombine.low %v709_v22, %v716_v23  ;;  %v2096_v29 = vcombine.high %v709_v22, %v716_v23  ;;  %v910_v30 = vcombine.low %v725_v25, %v732_v26  ;;  %v2097_v31 = vcombine.high %v725_v25, %v732_v26 }
 0x217   : > { %v901_v32 = vrot.slane %v894_v28, %v2736_v21  ;;  %v909_v33 = vrot.slane %v2096_v29, %v2736_v21  ;;  %v917_v34 = vrot.slane %v910_v30, %v2736_v21  ;;  %v925_v35 = vrot.slane %v2097_v31, %v2736_v21 }
 0x219   : > { %v926_v36 = vcombine.low %v901_v32, %v909_v33  ;;  %v927_v37 = vcombine.high %v901_v32, %v909_v33  ;;  %v942_v38 = vcombine.low %v917_v34, %v925_v35  ;;  %v943_v39 = vcombine.high %v917_v34, %v925_v35 }
 0x21b   : > { %v934_v40 = vrot.slane %v926_v36, %v2750_v27  ;;  %v941_v41 = vrot.slane %v927_v37, %v2750_v27  ;;  %v950_v42 = vrot.slane %v942_v38, %v2750_v27  ;;  %v957_v43 = vrot.slane %v943_v39, %v2750_v27 }
 0x21d   : > { %v958_v44 = vcombine.low %v934_v40, %v950_v42  ;;  %v959_v45 = vcombine.high %v934_v40, %v950_v42  ;;  %v960_v46 = vcombine.low %v941_v41, %v957_v43  ;;  %v961_v47 = vcombine.high %v941_v41, %v957_v43 }
 0x21f   : > { %v962_v48 = vpack.c.bf16 %v958_v44, %v958_v44  ;;  %v963_v49 = vpack.c.bf16 %v959_v45, %v959_v45  ;;  %v964_v50 = vpack.c.bf16 %v960_v46, %v960_v46  ;;  %v965_v51 = vpack.c.bf16 %v961_v47, %v961_v47 }
 0x221   : > { %966 = vst.msk [vmem:[#allocation3] sm:$0xf] %vm889_vm2, %v962_v48  ;;  %967 = vst.msk [vmem:[#allocation3 + $0x4] sm:$0xf] %vm889_vm2, %v963_v49 }
 0x222   : > { %968 = vst.msk [vmem:[#allocation3 + $0x8] sm:$0xf] %vm889_vm2, %v964_v50  ;;  %969 = vst.msk [vmem:[#allocation3 + $0xc] sm:$0xf] %vm889_vm2, %v965_v51 }
 0x228   : > { %v1057_v52 = vld [vmem:[#allocation3] sm:$0xf]  ;;  %v1058_v53 = vld [vmem:[#allocation3 + $0x4] sm:$0xf] }
 0x229   : > { %v1066_v54 = vsel %vm1061_vm3, %v1057_v52, 0  ;;  %v1112_v55 = vsel %vm1061_vm3, %v1058_v53, 0  ;;  %v1059_v56 = vld [vmem:[#allocation3 + $0x8] sm:$0xf]  ;;  %v1060_v57 = vld [vmem:[#allocation3 + $0xc] sm:$0xf] }
 0x22a   : > { %2173 = vmatpush3.bf16.xpose.msra.mxu1 %v1066_v54  ;;  %2179 = vmatpush3.bf16.xpose.msra.mxu0 %v1112_v55  ;;  %v1158_v60 = vsel %vm1061_vm3, %v1059_v56, 0  ;;  %v1204_v61 = vsel %vm1061_vm3, %v1060_v57, 0 }
 0x22b   : > { %2184 = vmatprep.subr.bf16.mxu1 %v2512_v0  ;;  %2190 = vmatprep.subr.bf16.mxu0 %v2512_v0 }
 0x231   : > { %2175 = vmatmul.mubr.msk.bf16.vlgmr.msra.gmra.mrb[0].mxu1 %vm1061_vm3, %v1053_v58  ;;  %2181 = vmatmul.mubr.msk.bf16.vlgmr.msra.gmra.mrb[4].mxu0 %vm1061_vm3, %v1054_v59 }
 0x232   : > { %2185 = vmatpush3.bf16.xpose.msra.mxu1 %v1158_v60  ;;  %2191 = vmatpush3.bf16.xpose.msra.mxu0 %v1204_v61 }
 0x233   : > { %2186 = vmatprep.mubr.msk.bf16.mxu1 %vm2513_vm0, %v2512_v0  ;;  %2192 = vmatprep.mubr.msk.bf16.mxu0 %vm2513_vm0, %v2512_v0 }
 0x234   : > { %2196 = vmatprep.subr.bf16.mxu1 %v2512_v0  ;;  %2202 = vmatprep.subr.bf16.mxu0 %v2512_v0 }
 0x239   : > { %2187 = vmatmul.mubr.msk.bf16.vlgmr.msra.gmra.mrb[4].mxu1 %vm1061_vm3, %v1055_v62  ;;  %2193 = vmatmul.mubr.msk.bf16.vlgmr.msra.gmra.mrb[8].mxu0 %vm1061_vm3, %v1056_v63 }
 0x23a   : > { %2198 = vmatprep.mubr.msk.bf16.mxu1 %vm2513_vm0, %v2512_v0  ;;  %2204 = vmatprep.mubr.msk.bf16.mxu0 %vm2513_vm0, %v2512_v0 }
 0x304   : > { %v1102_v1 = vpop.f32.mrb[0].mxu1  ;;  %v1148_v2 = vpop.f32.mrb[4].mxu0 }
 0x305   : > { %v1246_v4 = vmul.f32 0.35355338, %v1102_v1  ;;  %v1247_v5 = vmul.f32 0.35355338, %v1148_v2  ;;  %v2176_v6 = vpop.f32.mrb[1].mxu1  ;;  %v2182_v8 = vpop.f32.mrb[5].mxu0 }
 0x306   : > { %v1105_v9 = vpop.f32.mrb[2].mxu1  ;;  %v1151_v10 = vpop.f32.mrb[6].mxu0 }
 0x307   : > { %v2177_v11 = vpop.f32.mrb[3].mxu1  ;;  %v2183_v12 = vpop.f32.mrb[7].mxu0  ;;  %v1250_v13 = vsel %vm1061_vm3, %v1246_v4, -inf  ;;  %v1253_v14 = vsel %vm1061_vm3, %v1247_v5, -inf }
 0x308   : > { %1251 = vmax.xlane.f32.xlu1 %v1250_v13  ;;  %1254 = vmax.xlane.f32.xlu0 %v1253_v14 }
 0x30c   : > { %v1194_v15 = vpop.f32.mrb[4].mxu1  ;;  %v1240_v16 = vpop.f32.mrb[8].mxu0 }
 0x30d   : > { %v1248_v17 = vmul.f32 0.35355338, %v1194_v15  ;;  %v1249_v20 = vmul.f32 0.35355338, %v1240_v16  ;;  %v2188_v22 = vpop.f32.mrb[5].mxu1  ;;  %v2194_v23 = vpop.f32.mrb[9].mxu0 }
 0x30e   : > { %v1197_v25 = vpop.f32.mrb[6].mxu1  ;;  %v1243_v26 = vpop.f32.mrb[10].mxu0 }
 0x30f   : > { %v2189_v28 = vpop.f32.mrb[7].mxu1  ;;  %v2195_v29 = vpop.f32.mrb[11].mxu0  ;;  %v1256_v30 = vsel %vm1061_vm3, %v1248_v17, -inf  ;;  %v1259_v31 = vsel %vm1061_vm3, %v1249_v20, -inf }
 0x310   : > { %1257 = vmax.xlane.f32.xlu0 %v1256_v30  ;;  %1260 = vmax.xlane.f32.xlu1 %v1259_v31 }
 0x321   : > { %739 = vrot.lane.b32.xlu1 %v2733_v19, %s2520_s26 }
 0x325   : > { %741 = vrot.lane.b32.xlu1 %v2742_v24, %s2520_s26 }
 0x326   : > { %737 = vrot.lane.b32.xlu0 %v2725_v7, %s2520_s26 }
 0x32a   : > { %743 = vrot.lane.b32.xlu0 %v2731_v18, %s2520_s26 }
 0x395   : > { %v1252_v32 = vpop.xlane.xlu1 %1251  ;;  %v1255_v33 = vpop.xlane.xlu0 %1254 }
 0x396   : > { %v1262_v34 = vsub.f32 %v1246_v4, %v1252_v32  ;;  %v1263_v35 = vsub.f32 %v1247_v5, %v1255_v33 }
 0x398   : > { %v1266_v36 = vmul.f32 1.442695, %v1262_v34  ;;  %v1268_v37 = vmul.f32 1.442695, %v1263_v35 }
 0x39a   : > { %2345 = vpow2.f32 %v1266_v36 }
 0x39b   : > { %2347 = vpow2.f32 %v1268_v37 }
 0x39d   : > { %v1258_v38 = vpop.xlane.xlu0 %1257  ;;  %v1261_v39 = vpop.xlane.xlu1 %1260 }
 0x39e   : > { %v1264_v19 = vsub.f32 %v1248_v17, %v1258_v38  ;;  %v1265_v40 = vsub.f32 %v1249_v20, %v1261_v39 }
 0x3a0   : > { %v1270_v41 = vmul.f32 1.442695, %v1264_v19  ;;  %v1272_v24 = vmul.f32 1.442695, %v1265_v40 }
 0x3a1   : > { %v738_v42 = vpop.permute.xlu0 %737  ;;  %v740_v43 = vpop.permute.xlu1 %739 }
 0x3a2   : > { %2349 = vpow2.f32 %v1270_v41 }
 0x3a3   : > { %2351 = vpow2.f32 %v1272_v24 }
 0x3a4   : > { %v2824_v7 = vpop.eup %2345 }
 0x3a5   : > { %v2826_v18 = vpop.eup %2347  ;;  %v744_v44 = vpop.permute.xlu0 %743  ;;  %v1274_v46 = vsel %vm1061_vm3, %v2824_v7, 0.0 }
 0x3a6   : > { %v742_v45 = vpop.permute.xlu1 %741  ;;  %v765_v47 = vcombine.low %v740_v43, %v744_v44  ;;  %v766_v48 = vcombine.high %v740_v43, %v744_v44  ;;  %1275 = vadd.xlane.f32.xlu1 %v1274_v46  ;;  %v1277_v51 = vsel %vm1061_vm3, %v2826_v18, 0.0 }
 0x3a7   : > { %v749_v49 = vcombine.low %v738_v42, %v742_v45  ;;  %v750_v50 = vcombine.high %v738_v42, %v742_v45  ;;  %1278 = vadd.xlane.f32.xlu0 %v1277_v51 }
 0x3a8   : > { %v773_v52 = vrot.slane %v765_v47, %v2736_v21  ;;  %v780_v53 = vrot.slane %v766_v48, %v2736_v21 }
 0x3a9   : > { %v757_v54 = vrot.slane %v749_v49, %v2736_v21  ;;  %v764_v55 = vrot.slane %v750_v50, %v2736_v21 }
 0x3ab   : > { %v781_v56 = vcombine.low %v757_v54, %v773_v52  ;;  %v782_v57 = vcombine.high %v757_v54, %v773_v52  ;;  %v797_v58 = vcombine.low %v764_v55, %v780_v53  ;;  %v798_v59 = vcombine.high %v764_v55, %v780_v53 }
 0x3ac   : > { %v2836_v60 = vpop.eup %2349 }
 0x3ad   : > { %v789_v61 = vrot.slane %v781_v56, %v2750_v27  ;;  %v796_v62 = vrot.slane %v782_v57, %v2750_v27  ;;  %v805_v63 = vrot.slane %v797_v58, %v2750_v27  ;;  %v812_v1 = vrot.slane %v798_v59, %v2750_v27  ;;  %v2842_v2 = vpop.eup %2351 }
 0x3ae   : > { %v1280_v4 = vsel %vm1061_vm3, %v2836_v60, 0.0  ;;  %v1283_v10 = vsel %vm1061_vm3, %v2842_v2, 0.0 }
 0x3af   : > { %v970_v5 = vcombine.low %v789_v61, %v796_v62  ;;  %v2098_v6 = vcombine.high %v789_v61, %v796_v62  ;;  %v986_v8 = vcombine.low %v805_v63, %v812_v1  ;;  %v2099_v9 = vcombine.high %v805_v63, %v812_v1  ;;  %1281 = vadd.xlane.f32.xlu0 %v1280_v4 }
 0x3b0   : > { %1284 = vadd.xlane.f32.xlu1 %v1283_v10 }
 0x3b1   : > { %v977_v11 = vrot.slane %v970_v5, %v2736_v21  ;;  %v985_v12 = vrot.slane %v2098_v6, %v2736_v21  ;;  %v993_v13 = vrot.slane %v986_v8, %v2736_v21  ;;  %v1001_v14 = vrot.slane %v2099_v9, %v2736_v21 }
 0x3b3   : > { %v1002_v15 = vcombine.low %v977_v11, %v985_v12  ;;  %v1003_v16 = vcombine.high %v977_v11, %v985_v12  ;;  %v1018_v17 = vcombine.low %v993_v13, %v1001_v14  ;;  %v1019_v20 = vcombine.high %v993_v13, %v1001_v14 }
 0x3b5   : > { %v1010_v22 = vrot.slane %v1002_v15, %v2750_v27  ;;  %v1017_v23 = vrot.slane %v1003_v16, %v2750_v27  ;;  %v1026_v25 = vrot.slane %v1018_v17, %v2750_v27  ;;  %v1033_v26 = vrot.slane %v1019_v20, %v2750_v27 }
 0x3b7   : > { %v1034_v28 = vcombine.low %v1010_v22, %v1026_v25  ;;  %v1035_v29 = vcombine.high %v1010_v22, %v1026_v25  ;;  %v1036_v30 = vcombine.low %v1017_v23, %v1033_v26  ;;  %v1037_v31 = vcombine.high %v1017_v23, %v1033_v26 }
 0x3b9   : > { %v1038_v32 = vpack.c.bf16 %v1034_v28, %v1034_v28  ;;  %v1039_v33 = vpack.c.bf16 %v1035_v29, %v1035_v29  ;;  %v1040_v34 = vpack.c.bf16 %v1036_v30, %v1036_v30  ;;  %v1041_v35 = vpack.c.bf16 %v1037_v31, %v1037_v31  ;;  %v2337_v28 = vld [vmem:[%s3060_s3] sm:$0xff]  }
 0x3bb   : > { %1042 = vst.msk [vmem:[#allocation4] sm:$0xf] %vm889_vm2, %v1038_v32  ;;  %1043 = vst.msk [vmem:[#allocation4 + $0x4] sm:$0xf] %vm889_vm2, %v1039_v33 }
 0x3bc   : > { %1044 = vst.msk [vmem:[#allocation4 + $0x8] sm:$0xf] %vm889_vm2, %v1040_v34  ;;  %1045 = vst.msk [vmem:[#allocation4 + $0xc] sm:$0xf] %vm889_vm2, %v1041_v35 }
 0x3c2   : > { %v1303_v36 = vld [vmem:[#allocation4] sm:$0xf]  ;;  %v1304_v37 = vld [vmem:[#allocation4 + $0x4] sm:$0xf] }
 0x3c3   : > { %v1312_v38 = vsel %vm1310_vm4, %v1303_v36, 0  ;;  %v1358_v39 = vsel %vm1310_vm4, %v1304_v37, 0  ;;  %v1305_v45 = vld [vmem:[#allocation4 + $0x8] sm:$0xf]  ;;  %v1306_v48 = vld [vmem:[#allocation4 + $0xc] sm:$0xf] }
 0x3c4   : > { %2197 = vmatpush3.bf16.msra.mxu1 %v1312_v38  ;;  %2203 = vmatpush3.bf16.msra.mxu0 %v1358_v39  ;;  %v1404_v50 = vsel %vm1310_vm4, %v1305_v45, 0  ;;  %v2338_v37 = vld [vmem:[%s3060_s3 + $0x8] sm:$0xff]  }
 0x3c5   : > { %2208 = vmatprep.subr.bf16.mxu1 %v2512_v0  ;;  %2214 = vmatprep.subr.bf16.mxu0 %v2512_v0 }
 0x433   : > { %v1276_v19 = vpop.xlane.xlu1 %1275 }
 0x434   : > { %2353 = vrcp.f32 %v1276_v19  ;;  %v1279_v40 = vpop.xlane.xlu0 %1278 }
 0x435   : > { %2355 = vrcp.f32 %v1279_v40 }
 0x43c   : > { %v1282_v41 = vpop.xlane.xlu0 %1281 }
 0x43d   : > { %2357 = vrcp.f32 %v1282_v41  ;;  %v1285_v24 = vpop.xlane.xlu1 %1284 }
 0x43e   : > { %v2354_v42 = vpop.eup %2353  ;;  %2359 = vrcp.f32 %v1285_v24 }
 0x43f   : > { %v1290_v43 = vmul.f32 %v2354_v42, %v2824_v7  ;;  %v2356_v44 = vpop.eup %2355  ;;  %v1450_v7 = vsel %vm1310_vm4, %v1306_v48, 0 }
 0x440   : > { %v1291_v46 = vmul.f32 %v2356_v44, %v2826_v18 }
 0x441   : > { %v1294_v47 = vpack.c.bf16 %v1290_v43, %v1290_v43 }
 0x442   : > { %v1295_v49 = vpack.c.bf16 %v1291_v46, %v1291_v46 }
 0x443   : > { %2199 = vmatmul.mubr.msk.bf16.vlgmr.msra.gmra.mrb[8].mxu1 %vm1061_vm3, %v1294_v47  ;;  %1299 = vst.msk [vmem:[%s2872_s24] sm:$0xf] %vm889_vm2, %v1294_v47 }
 0x444   : > { %2209 = vmatpush3.bf16.msra.mxu1 %v1404_v50  ;;  %2210 = vmatprep.mubr.msk.bf16.mxu1 %vm2513_vm0, %v2512_v0  ;;  %1300 = vst.msk [vmem:[%s2872_s24 + $0x4] sm:$0xf] %vm889_vm2, %v1295_v49 }
 0x445   : > { %2205 = vmatmul.mubr.msk.bf16.vlgmr.msra.gmra.mrb[12].mxu0 %vm1061_vm3, %v1295_v49  ;;  %2220 = vmatprep.subr.bf16.mxu1 %v2512_v0 }
 0x446   : > { %2215 = vmatpush3.bf16.msra.mxu0 %v1450_v7  ;;  %2216 = vmatprep.mubr.msk.bf16.mxu0 %vm2513_vm0, %v2512_v0 }
 0x447   : > { %v2358_v18 = vpop.eup %2357  ;;  %2228 = vmatprep.subr.bf16.mxu0 %v2512_v0 }
 0x448   : > { %v1292_v51 = vmul.f32 %v2358_v18, %v2836_v60  ;;  %v2360_v52 = vpop.eup %2359 }
 0x449   : > { %v1293_v53 = vmul.f32 %v2360_v52, %v2842_v2 }
 0x44a   : > { %v1296_v54 = vpack.c.bf16 %v1292_v51, %v1292_v51 }
 0x44b   : > { %v1297_v55 = vpack.c.bf16 %v1293_v53, %v1293_v53 }
 0x44c   : > { %2211 = vmatmul.mubr.msk.bf16.vlgmr.msra.gmra.mrb[12].mxu1 %vm1061_vm3, %v1296_v54  ;;  %1301 = vst.msk [vmem:[%s2872_s24 + $0x8] sm:$0xf] %vm889_vm2, %v1296_v54 }
 0x44d   : > { %2224 = vmatprep.mubr.msk.bf16.mxu1 %vm2513_vm0, %v2512_v0  ;;  %2217 = vmatmul.mubr.msk.bf16.vlgmr.msra.gmra.mrb[16].mxu0 %vm1061_vm3, %v1297_v55  ;;  %1302 = vst.msk [vmem:[%s2872_s24 + $0xc] sm:$0xf] %vm889_vm2, %v1297_v55  ;;  %v2110_v55 = vld [vmem:[%s3061_s4] ss:$0 sm:$0xff] }
 0x44e   : > { %2232 = vmatprep.mubr.msk.bf16.mxu0 %vm2513_vm0, %v2512_v0  ;;  %2221 = vmatpush3.bf16.msra.mxu1 %v2337_v28 }
 0x44f   : > { %2222 = vmatprep.subr.bf16.mxu1 %v2512_v0 }
 0x452   : > { %2223 = vmatpush3.bf16.msra.mxu1 %v2338_v37 }
 0x453   : > { %2236 = vmatprep.subr.bf16.mxu1 %v2512_v0 }
 0x516   : > { %v1348_v56 = vpop.f32.mrb[8].mxu1 }
 0x517   : > { %v2200_v57 = vpop.f32.mrb[9].mxu1 }
 0x518   : > { %v1394_v58 = vpop.f32.mrb[12].mxu0  ;;  %v1351_v59 = vpop.f32.mrb[10].mxu1 }
 0x519   : > { %v2206_v60 = vpop.f32.mrb[13].mxu0  ;;  %v2201_v61 = vpop.f32.mrb[11].mxu1 }
 0x51a   : > { %v1397_v62 = vpop.f32.mrb[14].mxu0 }
 0x51b   : > { %v2207_v63 = vpop.f32.mrb[15].mxu0 }
 0x51f   : > { %v1440_v1 = vpop.f32.mrb[12].mxu1 }
 0x520   : > { %v1492_v2 = vcombine.low %v1348_v56, %v1440_v1  ;;  %v1493_v4 = vcombine.high %v1348_v56, %v1440_v1  ;;  %v2212_v5 = vpop.f32.mrb[13].mxu1  ;;  %v1486_v6 = vpop.f32.mrb[16].mxu0 }
 0x521   : > { %v1443_v8 = vpop.f32.mrb[14].mxu1  ;;  %v1508_v11 = vcombine.low %v1394_v58, %v1486_v6  ;;  %v1509_v12 = vcombine.high %v1394_v58, %v1486_v6  ;;  %v2218_v13 = vpop.f32.mrb[17].mxu0  ;;  %v2339_v6 = vld [vmem:[#allocation5] sm:$0xff]  }
 0x522   : > { %v1500_v9 = vrot.slane %v1492_v2, %v2736_v21  ;;  %v1507_v10 = vrot.slane %v1493_v4, %v2736_v21  ;;  %v2213_v14 = vpop.f32.mrb[15].mxu1  ;;  %v1489_v15 = vpop.f32.mrb[18].mxu0  ;;  %2229 = vmatpush3.bf16.msra.mxu0 %v2339_v6  ;;  %v2340_v8 = vld [vmem:[#allocation5 + $0x8] sm:$0xff]  }
 0x523   : > { %v1516_v16 = vrot.slane %v1508_v11, %v2736_v21  ;;  %v1523_v17 = vrot.slane %v1509_v12, %v2736_v21  ;;  %v2219_v20 = vpop.f32.mrb[19].mxu0  ;;  %2230 = vmatprep.subr.bf16.mxu0 %v2512_v0  ;;  %v2114_v14 = vld [vmem:[%s3062_s5] ss:$0 sm:$0xff] }
 0x525   : > { %v1524_v22 = vcombine.low %v1500_v9, %v1516_v16  ;;  %v1525_v23 = vcombine.high %v1500_v9, %v1516_v16  ;;  %v1540_v25 = vcombine.low %v1507_v10, %v1523_v17  ;;  %v1541_v26 = vcombine.high %v1507_v10, %v1523_v17  ;;  %v2342_v9 = vld [vmem:[%s3066_s9 + $0x8] sm:$0xff]   ;;  %v2115_v16 = vld [vmem:[%s3063_s6] ss:$0 sm:$0xff] }
 0x526   : > { %2231 = vmatpush3.bf16.msra.mxu0 %v2340_v8 }
 0x527   : > { %v1532_v29 = vrot.slane %v1524_v22, %v2750_v27  ;;  %v1539_v30 = vrot.slane %v1525_v23, %v2750_v27  ;;  %v1548_v31 = vrot.slane %v1540_v25, %v2750_v27  ;;  %v1555_v32 = vrot.slane %v1541_v26, %v2750_v27  ;;  %v2343_v23 = vld [vmem:[%s3066_s9 + $0x10] sm:$0xff]   ;;  %v2344_v25 = vld [vmem:[%s3066_s9 + $0x18] sm:$0xff]   ;;  %v2116_v26 = vld [vmem:[%s3065_s8] ss:$0 sm:$0xff] }
 0x529   : > { %v1560_v33 = vcombine.low %v1532_v29, %v1539_v30  ;;  %v2108_v34 = vcombine.high %v1532_v29, %v1539_v30  ;;  %v1576_v35 = vcombine.low %v1548_v31, %v1555_v32  ;;  %v2109_v36 = vcombine.high %v1548_v31, %v1555_v32 }
 0x52b   : > { %v1567_v38 = vrot.slane %v1560_v33, %v2736_v21  ;;  %v1575_v39 = vrot.slane %v2108_v34, %v2736_v21  ;;  %v1583_v19 = vrot.slane %v1576_v35, %v2736_v21  ;;  %v1591_v40 = vrot.slane %v2109_v36, %v2736_v21 }
 0x52d   : > { %v1593_v41 = vcombine.high %v1567_v38, %v1575_v39  ;;  %v1609_v24 = vcombine.high %v1583_v19, %v1591_v40  ;;  %v1592_v42 = vcombine.low %v1567_v38, %v1575_v39  ;;  %v1608_v43 = vcombine.low %v1583_v19, %v1591_v40 }
 0x52f   : > { %v1607_v44 = vrot.slane %v1593_v41, %v2750_v27  ;;  %v1623_v45 = vrot.slane %v1609_v24, %v2750_v27  ;;  %v1600_v46 = vrot.slane %v1592_v42, %v2750_v27  ;;  %v1616_v47 = vrot.slane %v1608_v43, %v2750_v27 }
 0x531   : > { %v1626_v48 = vcombine.low %v1607_v44, %v1623_v45  ;;  %v1625_v49 = vcombine.high %v1600_v46, %v1616_v47  ;;  %v1627_v50 = vcombine.high %v1607_v44, %v1623_v45  ;;  %v1624_v7 = vcombine.low %v1600_v46, %v1616_v47 }
 0x533   : > { %1633 = vrot.lane.b32.xlu1 %v1626_v48, %s2521_s19  ;;  %1629 = vrot.lane.b32.xlu0 %v1625_v49, %s2522_s29  ;;  %s2393_s19 = scalar_lea.vmem %s2965_s25, 256  ;;  %s2524_s29 = smov [#allocation9]  }
 0x534   : > { %p2394_p8 = scmp.ne.s32.totalorder %s2965_s25, %s2393_s19 }
 0x536   : > { %p2395_p11 = pnand %p2394_p8, %p3098_p10 }
 0x537   : > { %1637 = vrot.lane.b32.xlu1 %v1627_v50, %s2523_s21  ;;  %s2397_s21 = sshll.u32 %s2524_s29, 4  ;;  %s2398_s21 = int_to_ptr.vmem [resolvable:$false] %s2397_s21 }
 0x538   : > { %p2396_p13 = pneg %p2395_p11  ;;  %s2399_s24 = scalar_lea.vmem %s2398_s21, 512 }
 0x539   : > { %p2400_p1 = scmp.lt.s32.totalorder %s2965_s25, %s2398_s21  ;;  %p2401_p3 = scmp.lt.s32.totalorder %s2399_s24, %s2393_s19 }
 0x53b   : > { %p2402_p5 = por %p2401_p3, %p2400_p1 }
 0x53d   : > { %p2403_p6 = pnand %p2402_p5, %p2396_p13 }
 0x5a5   : > { %v1634_v21 = vpop.permute.xlu1 %1633  ;;  %v1630_v18 = vpop.permute.xlu0 %1629 }
 0x5a6   : > { %v1640_v51 = vsel %vm1061_vm3, %v1624_v7, %v1630_v18 }
 0x5a7   : > { %v1642_v53 = vsel %vm1641_vm5, %v1640_v51, %v1634_v21 }
 0x5a9   : > { %v1638_v52 = vpop.permute.xlu1 %1637 }
 0x5aa   : > { %v1644_v54 = vsel %vm1643_vm6, %v1642_v53, %v1638_v52 }
 0x5ab   : > { %v1645_v27 = vpack.c.bf16 %v1644_v54, %v1644_v54 }
 0x5ad   : > { %2225 = vmatmul.mubr.msk.bf16.vlgmr.msra.gmra.mrb[16].mxu1 %vm535_vm1, %v1645_v27 }
 0x5ae   : > { %2244 = vmatprep.mubr.msk.bf16.mxu1 %vm2513_vm0, %v2512_v0 }
 0x680   : > { %v1707_v56 = vpop.f32.mrb[16].mxu1 }
 0x681   : > { %v1708_v57 = vadd.f32 %v2110_v55, %v1707_v56  ;;  %v2226_v58 = vpop.f32.mrb[17].mxu1 }
 0x682   : > { %v1710_v59 = vpop.f32.mrb[18].mxu1 }
 0x683   : > { %v2227_v60 = vpop.f32.mrb[19].mxu1  ;;  %v1713_v61 = vadd.f32 %v1708_v57, %v2713_v3  ;;  %v2341_v3 = vld [vmem:[%s3066_s9] sm:$0xff]  }
 0x684   : > { %2237 = vmatpush3.bf16.msra.mxu1 %v2341_v3 }
 0x685   : > { %v1716_v62 = vsel %vm535_vm1, %v1713_v61, 0.0  ;;  %2238 = vmatprep.subr.bf16.mxu1 %v2512_v0 }
 0x686   : > { %1717 = vadd.xlane.f32.xlu0 %v1716_v62 }
 0x688   : > { %2239 = vmatpush3.bf16.msra.mxu1 %v2342_v9 }
 0x689   : > { %2240 = vmatprep.subr.bf16.mxu1 %v2512_v0 }
 0x68c   : > { %2241 = vmatpush3.bf16.msra.mxu1 %v2343_v23 }
 0x68d   : > { %2242 = vmatprep.subr.bf16.mxu1 %v2512_v0  ;;  %v2120_v0 = vld [vmem:[%s3067_s10] ss:$0 sm:$0xff] }
 0x690   : > { %2243 = vmatpush3.bf16.msra.mxu1 %v2344_v25 }
 0x713   : > { %v1718_v63 = vpop.xlane.xlu0 %1717 }
 0x714   : > { %v1720_v1 = vmul.f32 0.03125, %v1718_v63 }
 0x716   : > { %v1721_v2 = vsub.f32 %v1713_v61, %v1720_v1 }
 0x718   : > { %v1722_v4 = vmul.f32 %v1721_v2, %v1721_v2 }
 0x71a   : > { %v1723_v5 = vsel %vm535_vm1, %v1722_v4, 0.0 }
 0x71b   : > { %1724 = vadd.xlane.f32.xlu1 %v1723_v5 }
 0x7a8   : > { %v1725_v10 = vpop.xlane.xlu1 %1724 }
 0x7a9   : > { %v1726_v11 = vmul.f32 0.03125, %v1725_v10 }
 0x7ab   : > { %v1727_v12 = vadd.f32 1e-05, %v1726_v11 }
 0x7ad   : > { %2361 = vrsqrt.f32 %v1727_v12 }
 0x7b7   : > { %v2362_v13 = vpop.eup %2361 }
 0x7b8   : > { %v1729_v15 = vmul.f32 %v2362_v13, %v1721_v2 }
 0x7ba   : > { %v1736_v17 = vmul.f32 %v2114_v14, %v1729_v15 }
 0x7bc   : > { %v1743_v20 = vadd.f32 %v2115_v16, %v1736_v17 }
 0x7be   : > { %v1744_v22 = vpack.c.bf16 %v1743_v20, %v1743_v20 }
 0x7c0   : > { %2233 = vmatmul.mubr.msk.bf16.vlgmr.msra.gmra.mrb[20].mxu0 %vm535_vm1, %v1744_v22 }
 0x893   : > { %v1805_v28 = vpop.f32.mrb[20].mxu0 }
 0x894   : > { %v1806_v29 = vadd.f32 %v2116_v26, %v1805_v28  ;;  %v2234_v30 = vpop.f32.mrb[21].mxu0 }
 0x895   : > { %v1808_v31 = vpop.f32.mrb[22].mxu0 }
 0x896   : > { %v1811_v32 = vmax.f32 %v1806_v29, 0.0  ;;  %v2235_v33 = vpop.f32.mrb[23].mxu0 }
 0x898   : > { %v1812_v34 = vpack.c.bf16 %v1811_v32, %v1811_v32 }
 0x89a   : > { %2245 = vmatmul.mubr.msk.bf16.vlgmr.msra.gmra.mrb[20].mxu1 %vm1852_vm7, %v1812_v34 }
 0x96d   : > { %v1890_v35 = vpop.f32.mrb[20].mxu1 }
 0x96e   : > { %v1891_v36 = vadd.f32 %v2120_v0, %v1890_v35  ;;  %v2246_v37 = vpop.f32.mrb[21].mxu1 }
 0x96f   : > { %v1893_v38 = vpop.f32.mrb[22].mxu1 }
 0x970   : > { %v2247_v39 = vpop.f32.mrb[23].mxu1  ;;  %v1896_v19 = vadd.f32 %v1891_v36, %v1743_v20 }
 0x972   : > { %v1899_v40 = vsel %vm535_vm1, %v1896_v19, 0.0 }
 0x973   : > { %1900 = vadd.xlane.f32.xlu0 %v1899_v40 }
 0xa00   : > { %v1901_v41 = vpop.xlane.xlu0 %1900 }
 0xa01   : > { %v1902_v24 = vmul.f32 0.03125, %v1901_v41 }
 0xa03   : > { %v1903_v42 = vsub.f32 %v1896_v19, %v1902_v24 }
 0xa05   : > { %v1904_v43 = vmul.f32 %v1903_v42, %v1903_v42 }
 0xa07   : > { %v1905_v44 = vsel %vm535_vm1, %v1904_v43, 0.0 }
 0xa08   : > { %1906 = vadd.xlane.f32.xlu0 %v1905_v44 }
 0xa09   : > { %2406 = shalt.err (!%p2403_p6)
}
 0xa0a   : > { %s2407_s28 = scalar_lea.hbm %s2970_s17, 256  ;;  %s2411_s29 = scalar_lea.hbm %s3071_s14, 512 }
 0xa0b   : > { %p2408_p7 = scmp.ne.s32.totalorder %s2970_s17, %s2407_s28  ;;  %p2412_p0 = scmp.lt.u32.totalorder %s2970_s17, %s3071_s14 }
 0xa0c   : > { %p2413_p2 = scmp.lt.u32.totalorder %s2411_s29, %s2407_s28  ;;  %p2415_p8 = scmp.lt.u32.totalorder %s2407_s28, %s2970_s17 }
 0xa0d   : > { %p2409_p9 = pnand %p2408_p7, %p3098_p10 }
 0xa0e   : > { %p2414_p4 = por %p2413_p2, %p2412_p0 }
 0xa0f   : > { %p2410_p12 = pneg %p2409_p9 }
 0xa10   : > { %p2416_p11 = por %p2415_p8, %p2414_p4 }
 0xa12   : > { %p2417_p13 = pnand %p2416_p11, %p2410_p12 }
 0xa14   : > { %2420 = shalt.err (!%p2417_p13)
}
 0xa15   : > { %s2525_s19 = smov 128   ;;  %s2526_s24 = smov 4   ;;  %v2126_v49 = vld [vmem:[%s3068_s11] ss:$0 sm:$0xff] }
 0xa16   : > { %s3099_s20 = scalar_lea.sflag [#allocation10], %s2865_s27  ;;  %s2087_s22 = sshll.u32 %s2865_s27, 3  ;;  %v2127_v7 = vld [vmem:[%s3069_s12] ss:$0 sm:$0xff] }
 0xa17   : > { %2253 = dma.vmem_to_hbm [thread:$0]  (%p3098_p10), %s2965_s25, 256, %s2970_s17, %s3099_s20, %s2520_s26, %s2525_s19, %s2526_s24  }
 0xa18   : > { %s2130_s0 = sshll.u32 %s2499_s16, 7  ;;  %s493_s1 = scalar_lea.vmem [#allocation8], %s2087_s22 }
 0xa19   : > { %s1947_s26 = sshll.u32 %s493_s1, 4  ;;  %s3008_s19 = scalar_lea.hbm %s3070_s13, %s2130_s0  ;;  %s3010_s26 = int_to_ptr.vmem [resolvable:$true] %s1947_s26 }
 0xa1a   : > { %s1928_s24 = scalar_lea.sflag [#allocation7], %s2865_s27  ;;  %s2421_s20 = scalar_lea.vmem %s3010_s26, 128 }
 0xa1b   : > { %p2422_p1 = scmp.ne.s32.totalorder %s3010_s26, %s2421_s20  ;;  %s2527_s16 = smov [#allocation8]  }
 0xa1c   : > { %s2425_s22 = sshll.u32 %s2527_s16, 4  ;;  %s2426_s22 = int_to_ptr.vmem [resolvable:$false] %s2425_s22 }
 0xa1d   : > { %p2423_p3 = pnand %p2422_p1, %p3098_p10  ;;  %s2427_s28 = scalar_lea.vmem %s2426_s22, 256 }
 0xa1e   : > { %p2428_p6 = scmp.lt.s32.totalorder %s3010_s26, %s2426_s22  ;;  %p2429_p7 = scmp.lt.s32.totalorder %s2427_s28, %s2421_s20 }
 0xa1f   : > { %p2424_p5 = pneg %p2423_p3 }
 0xa20   : > { %p2430_p9 = por %p2429_p7, %p2428_p6 }
 0xa22   : > { %p2431_p12 = pnand %p2430_p9, %p2424_p5 }
 0xa95   : > { %v1907_v45 = vpop.xlane.xlu0 %1906 }
 0xa96   : > { %v1908_v46 = vmul.f32 0.03125, %v1907_v45 }
 0xa98   : > { %v1909_v47 = vadd.f32 1e-05, %v1908_v46 }
 0xa9a   : > { %2363 = vrsqrt.f32 %v1909_v47 }
 0xaa4   : > { %v2364_v48 = vpop.eup %2363 }
 0xaa5   : > { %v1911_v50 = vmul.f32 %v2364_v48, %v1903_v42 }
 0xaa7   : > { %v1918_v21 = vmul.f32 %v2126_v49, %v1911_v50 }
 0xaa9   : > { %v1925_v18 = vadd.f32 %v2127_v7, %v1918_v21 }
 0xaab   : > { %1926 = vst.msk [vmem:[%s493_s1] sm:$0xff] %vm535_vm1, %v1925_v18 }
 0xaac   : > { %2434 = shalt.err (!%p2431_p12)
}
 0xaad   : > { %s2435_s0 = scalar_lea.hbm %s3008_s19, 128  ;;  %s2439_s15 = scalar_lea.hbm %s3070_s13, 256 }
 0xaae   : > { %p2436_p0 = scmp.ne.s32.totalorder %s3008_s19, %s2435_s0  ;;  %p2440_p8 = scmp.lt.u32.totalorder %s3008_s19, %s3070_s13 }
 0xaaf   : > { %p2441_p11 = scmp.lt.u32.totalorder %s2439_s15, %s2435_s0  ;;  %p2443_p1 = scmp.lt.u32.totalorder %s2435_s0, %s3008_s19 }
 0xab0   : > { %p2437_p2 = pnand %p2436_p0, %p3098_p10 }
 0xab1   : > { %p2442_p13 = por %p2441_p11, %p2440_p8 }
 0xab2   : > { %p2438_p4 = pneg %p2437_p2 }
 0xab3   : > { %p2444_p3 = por %p2443_p1, %p2442_p13 }
 0xab5   : > { %p2445_p5 = pnand %p2444_p3, %p2438_p4 }
 0xab7   : > { %2448 = shalt.err (!%p2445_p5)
}
 0xab8   : > { %2252 = dma.vmem_to_hbm [thread:$0]  (%p3098_p10), %s3010_s26, 128, %s3008_s19, %s1928_s24  }
 0xab9 PF: > { %s3100_s25 = sld [smem:[#allocation14_spill]]  ;;  %s3101_s17 = sld [smem:[#allocation18_spill]] }
 0xaba   : > { %p2269_p6 = scmp.ge.s32.totalorder %s2507_s18, 2 }
 0xabf   : > { %s1975_s20 = sand.u32 1, %s3100_s25   ;;  %p3102_p7 = scmp.ne.s32.totalorder %s3101_s17, 0 }
 0xac0   : > { %s1976_s16 = scalar_lea.sflag [#allocation7], %s1975_s20 }
 0xac1   : > { %p2261_p9 = pnand %p2269_p6, %p3102_p7 }
 0xac3   : > { %2478 = dma.done.wait (!%p2261_p9), %s1976_s16, 128  }
 0xac4   : > { %2480 = vsyncadd (!%p2261_p9), %s1976_s16, 4294967168  ;;  %s1985_s22 = scalar_lea.sflag [#allocation10], %s1975_s20 }
 0xac5   : > { %2482 = dma.done.wait (!%p2261_p9), %s1985_s22, 256  }
 0xac6   : > { %2484 = vsyncadd (!%p2261_p9), %s1985_s22, 4294967040  ;;  %s32_s18 = sadd.s32 1, %s2507_s18   ;;  %s3103_s23 = sld [smem:[#allocation15_spill]] }
 0xac7   : > { %p29_p12 = scmp.ge.s32.totalorder %s32_s18, 4   ;;  %s3104_s15 = sld [smem:[#allocation19_spill]] }
 0xac8   : > { %s3105_s16 = sld [smem:[#allocation16_spill]]  ;;  %s3106_s17 = sld [smem:[#allocation17_spill]] }
 0xac9   : > { %s3107_s29 = smov %s2491_s30  ;;  %31 = sbr.rel (!%p29_p12) target bundleno = 10 (0xa), region = 135 }
 0xacc   : > { %s3108_s30 = smov %s3103_s23 }
 0xad0   :  { %1990 = vsyncpa [#allocation6], 1 }
 0xad1   :  { %1992 = vsyncpa [#allocation6 + $0x1], 1 }
 0xad2   :  { %1993 = vsyncpa [#allocation7], 1 }
 0xad3   :  { %1995 = vsyncpa [#allocation7 + $0x1], 1 }
 0xad4   :  { %1996 = vsyncpa [#allocation10], 1 }
 0xad5   :  { %1998 = vsyncpa [#allocation10 + $0x1], 1 }

</bundles_post_ra>
